<compile_context>
chip_gen: v7x
topology: tpu7x:2x2x1
jax: 0.10.0
libtpu: 0.0.40
codegen_flags: <defaults>
</compile_context>

<pallas_src>
import functools

import jax
import jax.numpy as jnp
from jax.experimental import pallas as pl
from jax.experimental.pallas import tpu as pltpu

LATENT_DIM = 20
HIDDEN = (128, 256, 512)
OUTPUT_SIZE = 28 * 28            # 784
MAX_TILE_M = 2048                # keep double-buffered f32 output well under
                                 # the 32 MiB scoped VMEM default (v7x-safe)


def _cdiv(a, b):
    return (a + b - 1) // b


def _round_up(a, b):
    return _cdiv(a, b) * b


def _detect_num_tensorcores():
    """Best-effort TensorCore count per chip (v7x = 2, v5e/v6e = 1)."""
    try:
        kind = jax.devices()[0].device_kind.lower()
        if "v7" in kind or "7x" in kind:
            return 2
    except Exception:
        pass
    return 1


def _decoder_kernel(
    x_ref,
    w1_ref, c1_ref,
    w2_ref, c2_ref,
    w3_ref, c3_ref,
    w4_ref, c4_ref,
    o_ref,
):
    """Fused 4-layer MLP forward for one batch tile (weights VMEM-resident).

    x and all weights are bf16 with BN scale pre-folded; biases/shifts are
    f32.  All matmuls accumulate in f32 on the MXU; epilogues stay in f32.
    """
    # Layer 1: Linear(+folded BN) -> ReLU   [Dropout = identity in eval]
    h = jnp.dot(x_ref[...], w1_ref[...],
                preferred_element_type=jnp.float32) + c1_ref[...]
    h = jnp.maximum(h, 0.0)

    # Layer 2
    h = jnp.dot(h.astype(jnp.bfloat16), w2_ref[...],
                preferred_element_type=jnp.float32) + c2_ref[...]
    h = jnp.maximum(h, 0.0)

    # Layer 3
    h = jnp.dot(h.astype(jnp.bfloat16), w3_ref[...],
                preferred_element_type=jnp.float32) + c3_ref[...]
    h = jnp.maximum(h, 0.0)

    # Layer 4: Linear -> Sigmoid (true 784 columns, no padding)
    z = jnp.dot(h.astype(jnp.bfloat16), w4_ref[...],
                preferred_element_type=jnp.float32) + c4_ref[...]
    o_ref[...] = jax.nn.sigmoid(z).astype(o_ref.dtype)


def _const_spec(shape):
    # Full-array block, same block index at every grid step (weights/biases).
    return pl.BlockSpec(shape, lambda i: tuple(0 for _ in shape))


@functools.partial(jax.jit,
                   static_argnames=("tile_m", "num_cores", "out_dtype"))
def decoder_forward(x, fused_params, *, tile_m=1024, num_cores=None,
                    out_dtype=jnp.float32):
    """x: [B, LATENT_DIM] float32 -> [B, OUTPUT_SIZE] (out_dtype)."""
    B, D = x.shape
    assert D == LATENT_DIM

    (w1, c1, w2, c2, w3, c3, w4, c4) = fused_params

    if num_cores is None:
        num_cores = _detect_num_tensorcores()

    # --- choose the effective batch tile ------------------------------------
    # Largest sublane-aligned tile <= requested (capped for VMEM safety).
    tm = min(tile_m, MAX_TILE_M)
    tm = min(tm, _round_up(B, 8))
    tm = max(tm, 8)
    # Megacore split only when the chip has 2 TensorCores AND the batch is
    # large enough to amortize the extra grid step's fixed overhead.
    if num_cores >= 2 and B >= 512 and _cdiv(B, tm) < num_cores:
        tm = max(8, _round_up(_cdiv(B, num_cores), 8))

    grid_m = _cdiv(B, tm)
    b_pad = grid_m * tm

    # Pre-cast matmul operand to bf16 in the wrapper (halves input DMA).
    x = x.astype(jnp.bfloat16)
    if b_pad != B:
        x = jnp.pad(x, ((0, b_pad - B), (0, 0)))

    in_specs = [
        pl.BlockSpec((tm, LATENT_DIM), lambda i: (i, 0)),
        _const_spec(w1.shape), _const_spec(c1.shape),
        _const_spec(w2.shape), _const_spec(c2.shape),
        _const_spec(w3.shape), _const_spec(c3.shape),
        _const_spec(w4.shape), _const_spec(c4.shape),
    ]
    # 784 == full last dim of the output array, so this block shape is legal;
    # only the trailing 16-lane remainder becomes a masked store.
    out_spec = pl.BlockSpec((tm, OUTPUT_SIZE), lambda i: (i, 0))

    out = pl.pallas_call(
        _decoder_kernel,
        out_shape=jax.ShapeDtypeStruct((b_pad, OUTPUT_SIZE), out_dtype),
        grid_spec=pltpu.PrefetchScalarGridSpec(
            num_scalar_prefetch=0,
            grid=(grid_m,),
            in_specs=in_specs,
            out_specs=out_spec,
        ),
        compiler_params=pltpu.CompilerParams(
            dimension_semantics=("parallel",),
        ),
    )(x, w1, c1, w2, c2, w3, c3, w4, c4)

    # Drop batch padding (no column padding anymore).
    if b_pad != B:
        out = out[:B]
    return out


def init_params(key):
    """Deterministic synthetic parameters matching the PyTorch module shapes.

    Linear weights are stored as [in, out]; BatchNorm1d (gamma, beta,
    running_mean, running_var) is represented as per-feature (scale, shift):
        scale = gamma / sqrt(running_var + eps)
        shift = beta - running_mean * scale
    """
    eps = 1e-5
    dims = (LATENT_DIM,) + HIDDEN + (OUTPUT_SIZE,)
    keys = jax.random.split(key, 16)
    ki = iter(range(16))

    params = []
    for li in range(4):
        fan_in, fan_out = dims[li], dims[li + 1]
        bound = 1.0 / jnp.sqrt(fan_in)
        w = jax.random.uniform(keys[next(ki)], (fan_in, fan_out),
                               jnp.float32, -bound, bound)
        b = jax.random.uniform(keys[next(ki)], (1, fan_out),
                               jnp.float32, -bound, bound)
        params.extend([w, b])
        if li < 3:  # BatchNorm on the 3 hidden layers
            gamma = 1.0 + 0.1 * jax.random.normal(keys[next(ki)], (1, fan_out), jnp.float32)
            beta = 0.1 * jax.random.normal(keys[next(ki)], (1, fan_out), jnp.float32)
            running_mean = jnp.zeros((1, fan_out), jnp.float32)
            running_var = jnp.ones((1, fan_out), jnp.float32)
            scale = gamma / jnp.sqrt(running_var + eps)
            shift = beta - running_mean * scale
            params.extend([scale, shift])
    return tuple(params)


def prepare_params(raw_params):
    """Offline transform: fold BN into weights, merge bias+shift, cast MXU
    operands (weights) to bf16.  No output-column padding (kernel writes the
    true 784 columns)."""
    (w1, b1, s1, t1,
     w2, b2, s2, t2,
     w3, b3, s3, t3,
     w4, b4) = raw_params

    def fold(w, b, s, t):
        wf = (w * s).astype(jnp.bfloat16)               # s: (1, out) scales columns
        c = (b * s + t).astype(jnp.float32)             # merged bias + BN shift
        return wf, c

    w1f, c1 = fold(w1, b1, s1, t1)
    w2f, c2 = fold(w2, b2, s2, t2)
    w3f, c3 = fold(w3, b3, s3, t3)

    w4f = w4.astype(jnp.bfloat16)
    c4 = b4.astype(jnp.float32)

    return (w1f, c1, w2f, c2, w3f, c3, w4f, c4)


def decoder_reference(x, raw_params):
    """Pure-JAX f32 reference (eval-mode semantics) for correctness checking."""
    (w1, b1, s1, t1, w2, b2, s2, t2, w3, b3, s3, t3, w4, b4) = raw_params
    h = jnp.maximum((x @ w1 + b1) * s1 + t1, 0.0)
    h = jnp.maximum((h @ w2 + b2) * s2 + t2, 0.0)
    h = jnp.maximum((h @ w3 + b3) * s3 + t3, 0.0)
    return jax.nn.sigmoid(h @ w4 + b4)


if __name__ == "__main__":
    key = jax.random.PRNGKey(0)
    pkey, xkey = jax.random.split(key)

    raw_params = init_params(pkey)
    fused_params = prepare_params(raw_params)

    B = 64
    x = jax.random.normal(xkey, (B, LATENT_DIM), jnp.float32)

    out = decoder_forward(x, fused_params)
    out = jax.block_until_ready(out)

    ref = decoder_reference(x, raw_params)
    assert out.shape == (B, OUTPUT_SIZE), out.shape
    # bf16 matmul operands -> relaxed tolerance vs. the f32 reference.
    max_err = float(jnp.max(jnp.abs(out - ref)))
    assert jnp.allclose(out, ref, atol=2e-2, rtol=2e-2), max_err

    print("KERNEL_OK")
</pallas_src>

<mosaic_0001>
module attributes {stable_mosaic.version = 11 : i64} {
  func.func @_decoder_kernel(%arg0: i32, %arg1: memref<64x20xbf16, #tpu.memory_space<vmem>>, %arg2: memref<20x128xbf16, #tpu.memory_space<vmem>>, %arg3: memref<1x128xf32, #tpu.memory_space<vmem>>, %arg4: memref<128x256xbf16, #tpu.memory_space<vmem>>, %arg5: memref<1x256xf32, #tpu.memory_space<vmem>>, %arg6: memref<256x512xbf16, #tpu.memory_space<vmem>>, %arg7: memref<1x512xf32, #tpu.memory_space<vmem>>, %arg8: memref<512x784xbf16, #tpu.memory_space<vmem>>, %arg9: memref<1x784xf32, #tpu.memory_space<vmem>>, %arg10: memref<64x784xf32, #tpu.memory_space<vmem>>) attributes {dimension_semantics = [#tpu.dimension_semantics<parallel>], iteration_bounds = array<i64: 1>, scalar_prefetch = 0 : i64, scratch_operands = 0 : i64, tpu.core_type = #tpu.core_type<tc>, window_params = [{transform_indices = @transform_0, window_bounds = array<i64: 64, 20>}, {pipeline_mode = #tpu.pipeline_mode<synchronous>, transform_indices = @transform_1, window_bounds = array<i64: 20, 128>}, {pipeline_mode = #tpu.pipeline_mode<synchronous>, transform_indices = @transform_2, window_bounds = array<i64: 1, 128>}, {pipeline_mode = #tpu.pipeline_mode<synchronous>, transform_indices = @transform_3, window_bounds = array<i64: 128, 256>}, {pipeline_mode = #tpu.pipeline_mode<synchronous>, transform_indices = @transform_4, window_bounds = array<i64: 1, 256>}, {pipeline_mode = #tpu.pipeline_mode<synchronous>, transform_indices = @transform_5, window_bounds = array<i64: 256, 512>}, {pipeline_mode = #tpu.pipeline_mode<synchronous>, transform_indices = @transform_6, window_bounds = array<i64: 1, 512>}, {pipeline_mode = #tpu.pipeline_mode<synchronous>, transform_indices = @transform_7, window_bounds = array<i64: 512, 784>}, {pipeline_mode = #tpu.pipeline_mode<synchronous>, transform_indices = @transform_8, window_bounds = array<i64: 1, 784>}, {transform_indices = @transform_9, window_bounds = array<i64: 64, 784>}]} {
    %c0 = arith.constant 0 : index
    %c0_0 = arith.constant 0 : index
    %0 = vector.load %arg1[%c0, %c0_0] : memref<64x20xbf16, #tpu.memory_space<vmem>>, vector<64x20xbf16>
    %c0_1 = arith.constant 0 : index
    %c0_2 = arith.constant 0 : index
    %1 = vector.load %arg2[%c0_1, %c0_2] : memref<20x128xbf16, #tpu.memory_space<vmem>>, vector<20x128xbf16>
    %cst = arith.constant dense<0.000000e+00> : vector<64x128xf32>
    %2 = tpu.matmul %0, %1, %cst {dimension_numbers = #tpu.dot_dimension_numbers<[1], [0], [0], [1], [0, 0, 1, 1], [], []>} : vector<64x20xbf16>, vector<20x128xbf16>, vector<64x128xf32> -> vector<64x128xf32>
    %c0_3 = arith.constant 0 : index
    %c0_4 = arith.constant 0 : index
    %3 = vector.load %arg3[%c0_3, %c0_4] : memref<1x128xf32, #tpu.memory_space<vmem>>, vector<1x128xf32>
    %4 = vector.broadcast %3 : vector<1x128xf32> to vector<64x128xf32>
    %5 = arith.addf %2, %4 : vector<64x128xf32>
    %cst_5 = arith.constant 0.000000e+00 : f32
    %6 = vector.broadcast %cst_5 : f32 to vector<64x128xf32>
    %7 = arith.maximumf %5, %6 : vector<64x128xf32>
    %8 = arith.truncf %7 : vector<64x128xf32> to vector<64x128xbf16>
    %c0_6 = arith.constant 0 : index
    %c0_7 = arith.constant 0 : index
    %9 = vector.load %arg4[%c0_6, %c0_7] : memref<128x256xbf16, #tpu.memory_space<vmem>>, vector<128x256xbf16>
    %cst_8 = arith.constant dense<0.000000e+00> : vector<64x256xf32>
    %10 = tpu.matmul %8, %9, %cst_8 {dimension_numbers = #tpu.dot_dimension_numbers<[1], [0], [0], [1], [0, 0, 1, 1], [], []>} : vector<64x128xbf16>, vector<128x256xbf16>, vector<64x256xf32> -> vector<64x256xf32>
    %c0_9 = arith.constant 0 : index
    %c0_10 = arith.constant 0 : index
    %11 = vector.load %arg5[%c0_9, %c0_10] : memref<1x256xf32, #tpu.memory_space<vmem>>, vector<1x256xf32>
    %12 = vector.broadcast %11 : vector<1x256xf32> to vector<64x256xf32>
    %13 = arith.addf %10, %12 : vector<64x256xf32>
    %cst_11 = arith.constant 0.000000e+00 : f32
    %14 = vector.broadcast %cst_11 : f32 to vector<64x256xf32>
    %15 = arith.maximumf %13, %14 : vector<64x256xf32>
    %16 = arith.truncf %15 : vector<64x256xf32> to vector<64x256xbf16>
    %c0_12 = arith.constant 0 : index
    %c0_13 = arith.constant 0 : index
    %17 = vector.load %arg6[%c0_12, %c0_13] : memref<256x512xbf16, #tpu.memory_space<vmem>>, vector<256x512xbf16>
    %cst_14 = arith.constant dense<0.000000e+00> : vector<64x512xf32>
    %18 = tpu.matmul %16, %17, %cst_14 {dimension_numbers = #tpu.dot_dimension_numbers<[1], [0], [0], [1], [0, 0, 1, 1], [], []>} : vector<64x256xbf16>, vector<256x512xbf16>, vector<64x512xf32> -> vector<64x512xf32>
    %c0_15 = arith.constant 0 : index
    %c0_16 = arith.constant 0 : index
    %19 = vector.load %arg7[%c0_15, %c0_16] : memref<1x512xf32, #tpu.memory_space<vmem>>, vector<1x512xf32>
    %20 = vector.broadcast %19 : vector<1x512xf32> to vector<64x512xf32>
    %21 = arith.addf %18, %20 : vector<64x512xf32>
    %cst_17 = arith.constant 0.000000e+00 : f32
    %22 = vector.broadcast %cst_17 : f32 to vector<64x512xf32>
    %23 = arith.maximumf %21, %22 : vector<64x512xf32>
    %24 = arith.truncf %23 : vector<64x512xf32> to vector<64x512xbf16>
    %c0_18 = arith.constant 0 : index
    %c0_19 = arith.constant 0 : index
    %25 = vector.load %arg8[%c0_18, %c0_19] : memref<512x784xbf16, #tpu.memory_space<vmem>>, vector<512x784xbf16>
    %cst_20 = arith.constant dense<0.000000e+00> : vector<64x784xf32>
    %26 = tpu.matmul %24, %25, %cst_20 {dimension_numbers = #tpu.dot_dimension_numbers<[1], [0], [0], [1], [0, 0, 1, 1], [], []>} : vector<64x512xbf16>, vector<512x784xbf16>, vector<64x784xf32> -> vector<64x784xf32>
    %c0_21 = arith.constant 0 : index
    %c0_22 = arith.constant 0 : index
    %27 = vector.load %arg9[%c0_21, %c0_22] : memref<1x784xf32, #tpu.memory_space<vmem>>, vector<1x784xf32>
    %28 = vector.broadcast %27 : vector<1x784xf32> to vector<64x784xf32>
    %29 = arith.addf %26, %28 : vector<64x784xf32>
    %30 = arith.negf %29 : vector<64x784xf32>
    %31 = math.exp %30 : vector<64x784xf32>
    %cst_23 = arith.constant 1.000000e+00 : f32
    %32 = vector.broadcast %cst_23 : f32 to vector<64x784xf32>
    %33 = arith.addf %32, %31 : vector<64x784xf32>
    %34 = arith.divf %32, %33 : vector<64x784xf32>
    %c0_24 = arith.constant 0 : index
    %c0_25 = arith.constant 0 : index
    %35 = vector.load %arg10[%c0_24, %c0_25] : memref<64x784xf32, #tpu.memory_space<vmem>>, vector<64x784xf32>
    tpu.vector_store %arg10[%c0_24, %c0_25], %34 {strides = array<i32>} : memref<64x784xf32, #tpu.memory_space<vmem>>, vector<64x784xf32>,
    return
  }
  func.func @transform_0(%arg0: i32) -> (i32, i32) {
    %c0_i32 = arith.constant 0 : i32
    %c0_i32_0 = arith.constant 0 : i32
    return %arg0, %c0_i32 : i32, i32
  }
  func.func @transform_1(%arg0: i32) -> (i32, i32) {
    %c0_i32 = arith.constant 0 : i32
    %c0_i32_0 = arith.constant 0 : i32
    %c0_i32_1 = arith.constant 0 : i32
    return %c0_i32, %c0_i32_0 : i32, i32
  }
  func.func @transform_2(%arg0: i32) -> (i32, i32) {
    %c0_i32 = arith.constant 0 : i32
    %c0_i32_0 = arith.constant 0 : i32
    %c0_i32_1 = arith.constant 0 : i32
    return %c0_i32, %c0_i32_0 : i32, i32
  }
  func.func @transform_3(%arg0: i32) -> (i32, i32) {
    %c0_i32 = arith.constant 0 : i32
    %c0_i32_0 = arith.constant 0 : i32
    %c0_i32_1 = arith.constant 0 : i32
    return %c0_i32, %c0_i32_0 : i32, i32
  }
  func.func @transform_4(%arg0: i32) -> (i32, i32) {
    %c0_i32 = arith.constant 0 : i32
    %c0_i32_0 = arith.constant 0 : i32
    %c0_i32_1 = arith.constant 0 : i32
    return %c0_i32, %c0_i32_0 : i32, i32
  }
  func.func @transform_5(%arg0: i32) -> (i32, i32) {
    %c0_i32 = arith.constant 0 : i32
    %c0_i32_0 = arith.constant 0 : i32
    %c0_i32_1 = arith.constant 0 : i32
    return %c0_i32, %c0_i32_0 : i32, i32
  }
  func.func @transform_6(%arg0: i32) -> (i32, i32) {
    %c0_i32 = arith.constant 0 : i32
    %c0_i32_0 = arith.constant 0 : i32
    %c0_i32_1 = arith.constant 0 : i32
    return %c0_i32, %c0_i32_0 : i32, i32
  }
  func.func @transform_7(%arg0: i32) -> (i32, i32) {
    %c0_i32 = arith.constant 0 : i32
    %c0_i32_0 = arith.constant 0 : i32
    %c0_i32_1 = arith.constant 0 : i32
    return %c0_i32, %c0_i32_0 : i32, i32
  }
  func.func @transform_8(%arg0: i32) -> (i32, i32) {
    %c0_i32 = arith.constant 0 : i32
    %c0_i32_0 = arith.constant 0 : i32
    %c0_i32_1 = arith.constant 0 : i32
    return %c0_i32, %c0_i32_0 : i32, i32
  }
  func.func @transform_9(%arg0: i32) -> (i32, i32) {
    %c0_i32 = arith.constant 0 : i32
    %c0_i32_0 = arith.constant 0 : i32
    return %arg0, %c0_i32 : i32, i32
  }
}

</mosaic_0001>

<bundles_post_ra>
// kernel: decoder_forward.1
= control target key start
LH: loop header
LB: loop body
LE: loop exit
PB: predicated region body
PF: predicated region fallthrough
CT: control target
= control target key end

     0   :  { %vm94_vm0 = vcmask 1041408   ;;  %vm81_vm1 = vcmask 162816   ;;  %v4666_v23 = vmov 0   ;;  %s6003_s0 = inlined_call_operand.vmem [shape: bf16[64,20], index: 0, kind: input, shape index: {}]   ;;  %s6004_s1 = inlined_call_operand.vmem [shape: bf16[20,128], index: 1, kind: input, shape index: {}]   ;;  %s6005_s2 = inlined_call_operand.vmem [shape: f32[1,128], index: 2, kind: input, shape index: {}]   ;;  %s6006_s3 = inlined_call_operand.vmem [shape: bf16[128,256], index: 3, kind: input, shape index: {}]   ;;  %s6007_s4 = inlined_call_operand.vmem [shape: f32[1,256], index: 4, kind: input, shape index: {}]   ;;  %s6008_s5 = inlined_call_operand.vmem [shape: bf16[256,512], index: 5, kind: input, shape index: {}]   ;;  %s6009_s6 = inlined_call_operand.vmem [shape: f32[1,512], index: 6, kind: input, shape index: {}]   ;;  %s6010_s7 = inlined_call_operand.vmem [shape: bf16[512,784], index: 7, kind: input, shape index: {}]   ;;  %s6011_s8 = inlined_call_operand.vmem [shape: f32[1,784], index: 8, kind: input, shape index: {}]   ;;  %s6012_s9 = inlined_call_operand.hbm [shape: f32[64,784], index: 9, kind: output, shape index: {}]  }
   0x1   :  { %v3972_v0 = vld [vmem:[%s6004_s1] sm:$0xff]   ;;  %v3973_v1 = vld [vmem:[%s6004_s1 + $0x8] ss:$0 sps:$4 sm:$0x33]   ;;  %v3976_v5 = vld [vmem:[%s6003_s0 + $0x10] sm:$0xff]  }
   0x2   :  { %v3974_v2 = vld [vmem:[%s6003_s0] sm:$0xff]   ;;  %3859 = vmatprep.subr.bf16.mxu1 %v3972_v0  ;;  %v96_v3 = vsel %vm94_vm0, %v3973_v1, 0  ;;  %v3975_v4 = vld [vmem:[%s6003_s0 + $0x8] sm:$0xff]   ;;  %v3983_v8 = vld [vmem:[%s6006_s3 + $0x14] ss:$8 sps:$4 sm:$0xff]  }
   0x3   :  { %3860 = vmatpush3.bf16.msra.mxu1 %v3972_v0  ;;  %3863 = vmatprep.mubr.msk.bf16.mxu1 %vm81_vm1, %v3974_v2  ;;  %v3980_v6 = vld [vmem:[%s6006_s3 + $0x4] ss:$8 sps:$4 sm:$0xff]   ;;  %v3978_v7 = vld [vmem:[%s6006_s3] ss:$8 sps:$4 sm:$0xff]   ;;  %v3981_v9 = vld [vmem:[%s6006_s3 + $0x10] ss:$8 sps:$4 sm:$0xff]  }
   0x4   :  { %3967 = vmatprep.subr.msk.bf16.mxu1 %vm94_vm0, %v3973_v1  ;;  %v3986_v10 = vld [vmem:[%s6006_s3 + $0x24] ss:$8 sps:$4 sm:$0xff]   ;;  %v3977_v11 = vld [vmem:[%s6003_s0 + $0x18] sm:$0xff]   ;;  %v3984_v12 = vld [vmem:[%s6006_s3 + $0x20] ss:$8 sps:$4 sm:$0xff]  }
   0x5   :  { %v3989_v13 = vld [vmem:[%s6006_s3 + $0x34] ss:$8 sps:$4 sm:$0xff]   ;;  %v3987_v14 = vld [vmem:[%s6006_s3 + $0x30] ss:$8 sps:$4 sm:$0xff]   ;;  %v3992_v15 = vld [vmem:[%s6006_s3 + $0x44] ss:$8 sps:$4 sm:$0xff]  }
   0x6   :  { %v3990_v16 = vld [vmem:[%s6006_s3 + $0x40] ss:$8 sps:$4 sm:$0xff]   ;;  %v3995_v17 = vld [vmem:[%s6006_s3 + $0x54] ss:$8 sps:$4 sm:$0xff]   ;;  %v3993_v18 = vld [vmem:[%s6006_s3 + $0x50] ss:$8 sps:$4 sm:$0xff]  }
   0x7   :  { %3862 = vmatpush3.bf16.msra.mxu1 %v96_v3  ;;  %v3998_v19 = vld [vmem:[%s6006_s3 + $0x64] ss:$8 sps:$4 sm:$0xff]   ;;  %v3996_v20 = vld [vmem:[%s6006_s3 + $0x60] ss:$8 sps:$4 sm:$0xff]   ;;  %v4001_v21 = vld [vmem:[%s6006_s3 + $0x74] ss:$8 sps:$4 sm:$0xff]  }
   0x8   :  { %283 = vmatprep.subr.bf16.mxu1 %v3980_v6  ;;  %v3999_v22 = vld [vmem:[%s6006_s3 + $0x70] ss:$8 sps:$4 sm:$0xff]  }
   0xa   :  { %3864 = vmatmul.mubr.msk.bf16.vlgmr.msra.gmra.mrb[0].mxu1 %vm81_vm1, %v3975_v4 }
   0xb   :  { %3867 = vmatprep.mubr.msk.bf16.mxu1 %vm81_vm1, %v3976_v5  ;;  %284 = vmatpush1.bf16.msra.mxu1 %v3978_v7 }
   0xc   :  { %285 = vmatprep.subr.bf16.mxu1 %v3983_v8 }
   0xf   :  { %286 = vmatpush1.bf16.msra.mxu1 %v3981_v9 }
  0x10   :  { %287 = vmatprep.subr.bf16.mxu1 %v3986_v10 }
  0x12   :  { %3868 = vmatmul.mubr.msk.bf16.gmra.mrb[4].mxu1 %vm81_vm1, %v3977_v11 }
  0x13   :  { %288 = vmatpush1.bf16.msra.mxu1 %v3984_v12  ;;  %315 = vmatprep.mubr.bf16.mxu1 %v4666_v23 }
  0x14   :  { %289 = vmatprep.subr.bf16.mxu1 %v3989_v13 }
  0x17   :  { %290 = vmatpush1.bf16.msra.mxu1 %v3987_v14 }
  0x18   :  { %291 = vmatprep.subr.bf16.mxu1 %v3992_v15 }
  0x1b   :  { %292 = vmatpush1.bf16.msra.mxu1 %v3990_v16 }
  0x1c   :  { %293 = vmatprep.subr.bf16.mxu1 %v3995_v17 }
  0x1f   :  { %294 = vmatpush1.bf16.msra.mxu1 %v3993_v18 }
  0x20   :  { %295 = vmatprep.subr.bf16.mxu1 %v3998_v19 }
  0x23   :  { %296 = vmatpush1.bf16.msra.mxu1 %v3996_v20 }
  0x24   :  { %297 = vmatprep.subr.bf16.mxu1 %v4001_v21 }
  0x27   :  { %298 = vmatpush1.bf16.msra.mxu1 %v3999_v22 }
  0x28   :  { %14 = vsyncpa [#allocation3], 0  ;;  %v4002_v24 = vld [vmem:[%s6008_s5 + $0x4] ss:$16 sps:$4 sm:$0xff]   ;;  %v4006_v25 = vld [vmem:[%s6008_s5 + $0xc] ss:$16 sps:$4 sm:$0xff]  }
  0x29   :  { %v4007_v26 = vld [vmem:[%s6008_s5] ss:$16 sps:$4 sm:$0xff]   ;;  %v4008_v27 = vld [vmem:[%s6008_s5 + $0x24] ss:$16 sps:$4 sm:$0xff]   ;;  %786 = vmatprep.subr.bf16.mxu0 %v4002_v24  ;;  %859 = vmatprep.subr.bf16.mxu1 %v4006_v25  ;;  %v4004_v2 = vld [vmem:[%s6008_s5 + $0x8] ss:$16 sps:$4 sm:$0xff]  }
  0x2a   :  { %787 = vmatpush1.bf16.msra.mxu0 %v4007_v26  ;;  %v4013_v28 = vld [vmem:[%s6008_s5 + $0x20] ss:$16 sps:$4 sm:$0xff]   ;;  %v4014_v29 = vld [vmem:[%s6008_s5 + $0x44] ss:$16 sps:$4 sm:$0xff]   ;;  %v4012_v5 = vld [vmem:[%s6008_s5 + $0x2c] ss:$16 sps:$4 sm:$0xff]  }
  0x2b   :  { %788 = vmatprep.subr.bf16.mxu0 %v4008_v27  ;;  %v4019_v30 = vld [vmem:[%s6008_s5 + $0x40] ss:$16 sps:$4 sm:$0xff]   ;;  %v4020_v31 = vld [vmem:[%s6008_s5 + $0x64] ss:$16 sps:$4 sm:$0xff]   ;;  %v4010_v13 = vld [vmem:[%s6008_s5 + $0x28] ss:$16 sps:$4 sm:$0xff]  }
  0x2c   :  { %v4025_v32 = vld [vmem:[%s6008_s5 + $0x60] ss:$16 sps:$4 sm:$0xff]   ;;  %v4026_v33 = vld [vmem:[%s6008_s5 + $0x84] ss:$16 sps:$4 sm:$0xff]   ;;  %v4018_v16 = vld [vmem:[%s6008_s5 + $0x4c] ss:$16 sps:$4 sm:$0xff]  }
  0x2d   :  { %v4031_v34 = vld [vmem:[%s6008_s5 + $0x80] ss:$16 sps:$4 sm:$0xff]   ;;  %v4032_v35 = vld [vmem:[%s6008_s5 + $0xa4] ss:$16 sps:$4 sm:$0xff]   ;;  %v4016_v20 = vld [vmem:[%s6008_s5 + $0x48] ss:$16 sps:$4 sm:$0xff]  }
  0x2e   :  { %789 = vmatpush1.bf16.msra.mxu0 %v4013_v28  ;;  %v4037_v36 = vld [vmem:[%s6008_s5 + $0xa0] ss:$16 sps:$4 sm:$0xff]   ;;  %v4038_v37 = vld [vmem:[%s6008_s5 + $0xc4] ss:$16 sps:$4 sm:$0xff]   ;;  %v4024_v22 = vld [vmem:[%s6008_s5 + $0x6c] ss:$16 sps:$4 sm:$0xff]  }
  0x2f   :  { %790 = vmatprep.subr.bf16.mxu0 %v4014_v29  ;;  %v4043_v38 = vld [vmem:[%s6008_s5 + $0xc0] ss:$16 sps:$4 sm:$0xff]   ;;  %v4044_v39 = vld [vmem:[%s6008_s5 + $0xe4] ss:$16 sps:$4 sm:$0xff]   ;;  %v4022_v24 = vld [vmem:[%s6008_s5 + $0x68] ss:$16 sps:$4 sm:$0xff]  }
  0x30   :  { %v4049_v40 = vld [vmem:[%s6008_s5 + $0xe0] ss:$16 sps:$4 sm:$0xff]   ;;  %v4050_v41 = vld [vmem:[%s6008_s5 + $0x104] ss:$16 sps:$4 sm:$0xff]   ;;  %v4030_v25 = vld [vmem:[%s6008_s5 + $0x8c] ss:$16 sps:$4 sm:$0xff]  }
  0x31   :  { %v4055_v42 = vld [vmem:[%s6008_s5 + $0x100] ss:$16 sps:$4 sm:$0xff]   ;;  %v4056_v43 = vld [vmem:[%s6008_s5 + $0x124] ss:$16 sps:$4 sm:$0xff]   ;;  %v4028_v26 = vld [vmem:[%s6008_s5 + $0x88] ss:$16 sps:$4 sm:$0xff]  }
  0x32   :  { %791 = vmatpush1.bf16.msra.mxu0 %v4019_v30  ;;  %v4061_v44 = vld [vmem:[%s6008_s5 + $0x120] ss:$16 sps:$4 sm:$0xff]   ;;  %v4062_v45 = vld [vmem:[%s6008_s5 + $0x144] ss:$16 sps:$4 sm:$0xff]   ;;  %v4036_v27 = vld [vmem:[%s6008_s5 + $0xac] ss:$16 sps:$4 sm:$0xff]  }
  0x33   :  { %792 = vmatprep.subr.bf16.mxu0 %v4020_v31  ;;  %v4067_v46 = vld [vmem:[%s6008_s5 + $0x140] ss:$16 sps:$4 sm:$0xff]   ;;  %v4068_v47 = vld [vmem:[%s6008_s5 + $0x164] ss:$16 sps:$4 sm:$0xff]   ;;  %v4034_v28 = vld [vmem:[%s6008_s5 + $0xa8] ss:$16 sps:$4 sm:$0xff]  }
  0x34   :  { %v4073_v48 = vld [vmem:[%s6008_s5 + $0x160] ss:$16 sps:$4 sm:$0xff]   ;;  %v4074_v49 = vld [vmem:[%s6008_s5 + $0x184] ss:$16 sps:$4 sm:$0xff]   ;;  %v4042_v29 = vld [vmem:[%s6008_s5 + $0xcc] ss:$16 sps:$4 sm:$0xff]  }
  0x35   :  { %v4079_v50 = vld [vmem:[%s6008_s5 + $0x180] ss:$16 sps:$4 sm:$0xff]   ;;  %v4080_v51 = vld [vmem:[%s6008_s5 + $0x1a4] ss:$16 sps:$4 sm:$0xff]   ;;  %v4040_v30 = vld [vmem:[%s6008_s5 + $0xc8] ss:$16 sps:$4 sm:$0xff]  }
  0x36   :  { %793 = vmatpush1.bf16.msra.mxu0 %v4025_v32  ;;  %v3402_v52 = vld [vmem:[%s6005_s2] ss:$0 sm:$0xff]  ;;  %v4046_v31 = vld [vmem:[%s6008_s5 + $0xe8] ss:$16 sps:$4 sm:$0xff]   ;;  %v4054_v32 = vld [vmem:[%s6008_s5 + $0x10c] ss:$16 sps:$4 sm:$0xff]  }
  0x37   :  { %794 = vmatprep.subr.bf16.mxu0 %v4026_v33  ;;  %v4052_v33 = vld [vmem:[%s6008_s5 + $0x108] ss:$16 sps:$4 sm:$0xff]   ;;  %vm3335_vm2 = vcmask 130048  }
  0x3a   :  { %795 = vmatpush1.bf16.msra.mxu0 %v4031_v34  ;;  %v4060_v34 = vld [vmem:[%s6008_s5 + $0x12c] ss:$16 sps:$4 sm:$0xff]  }
  0x3b   :  { %796 = vmatprep.subr.bf16.mxu0 %v4032_v35  ;;  %v4058_v35 = vld [vmem:[%s6008_s5 + $0x128] ss:$16 sps:$4 sm:$0xff]  }
  0x3e   :  { %797 = vmatpush1.bf16.msra.mxu0 %v4037_v36  ;;  %v4066_v36 = vld [vmem:[%s6008_s5 + $0x14c] ss:$16 sps:$4 sm:$0xff]  }
  0x3f   :  { %798 = vmatprep.subr.bf16.mxu0 %v4038_v37  ;;  %v4064_v37 = vld [vmem:[%s6008_s5 + $0x148] ss:$16 sps:$4 sm:$0xff]  }
  0x42   :  { %799 = vmatpush1.bf16.msra.mxu0 %v4043_v38  ;;  %v4072_v38 = vld [vmem:[%s6008_s5 + $0x16c] ss:$16 sps:$4 sm:$0xff]  }
  0x43   :  { %800 = vmatprep.subr.bf16.mxu0 %v4044_v39  ;;  %v4070_v39 = vld [vmem:[%s6008_s5 + $0x168] ss:$16 sps:$4 sm:$0xff]  }
  0x46   :  { %801 = vmatpush1.bf16.msra.mxu0 %v4049_v40  ;;  %v4078_v40 = vld [vmem:[%s6008_s5 + $0x18c] ss:$16 sps:$4 sm:$0xff]  }
  0x47   :  { %802 = vmatprep.subr.bf16.mxu0 %v4050_v41  ;;  %v4076_v41 = vld [vmem:[%s6008_s5 + $0x188] ss:$16 sps:$4 sm:$0xff]  }
  0x4a   :  { %803 = vmatpush1.bf16.msra.mxu0 %v4055_v42  ;;  %v4084_v42 = vld [vmem:[%s6008_s5 + $0x1ac] ss:$16 sps:$4 sm:$0xff]  }
  0x4b   :  { %804 = vmatprep.subr.bf16.mxu0 %v4056_v43  ;;  %v4082_v43 = vld [vmem:[%s6008_s5 + $0x1a8] ss:$16 sps:$4 sm:$0xff]  }
  0x4e   :  { %805 = vmatpush1.bf16.msra.mxu0 %v4061_v44  ;;  %v4085_v44 = vld [vmem:[%s6008_s5 + $0x1a0] ss:$16 sps:$4 sm:$0xff]  }
  0x4f   :  { %806 = vmatprep.subr.bf16.mxu0 %v4062_v45  ;;  %v4086_v45 = vld [vmem:[%s6008_s5 + $0x1c4] ss:$16 sps:$4 sm:$0xff]  }
  0x52   :  { %807 = vmatpush1.bf16.msra.mxu0 %v4067_v46  ;;  %v4090_v46 = vld [vmem:[%s6008_s5 + $0x1cc] ss:$16 sps:$4 sm:$0xff]  }
  0x53   :  { %808 = vmatprep.subr.bf16.mxu0 %v4068_v47  ;;  %v4088_v47 = vld [vmem:[%s6008_s5 + $0x1c8] ss:$16 sps:$4 sm:$0xff]  }
  0x56   :  { %809 = vmatpush1.bf16.msra.mxu0 %v4073_v48  ;;  %v4091_v48 = vld [vmem:[%s6008_s5 + $0x1c0] ss:$16 sps:$4 sm:$0xff]  }
  0x57   :  { %810 = vmatprep.subr.bf16.mxu0 %v4074_v49  ;;  %v4092_v49 = vld [vmem:[%s6008_s5 + $0x1e4] ss:$16 sps:$4 sm:$0xff]  }
  0x5a   :  { %811 = vmatpush1.bf16.msra.mxu0 %v4079_v50  ;;  %v4096_v50 = vld [vmem:[%s6008_s5 + $0x1ec] ss:$16 sps:$4 sm:$0xff]  }
  0x5b   :  { %812 = vmatprep.subr.bf16.mxu0 %v4080_v51  ;;  %v4094_v51 = vld [vmem:[%s6008_s5 + $0x1e8] ss:$16 sps:$4 sm:$0xff]  }
  0x5e   :  { %813 = vmatpush1.bf16.msra.mxu0 %v4085_v44 }
  0x5f   :  { %814 = vmatprep.subr.bf16.mxu0 %v4086_v45 }
  0x62   :  { %815 = vmatpush1.bf16.msra.mxu0 %v4091_v48  ;;  %v4116_v48 = vld [vmem:[%s6010_s7 + $0xa8] ss:$28 sps:$4 sm:$0xff]  }
  0x63   :  { %816 = vmatprep.subr.bf16.mxu0 %v4092_v49  ;;  %v4119_v49 = vld [vmem:[%s6010_s7 + $0xb0] ss:$28 sps:$4 sm:$0xff]  }
  0xdd   :  { %v3865_v53 = vpop.f32.mrb[0].mxu1 }
  0xde   :  { %v141_v54 = vadd.f32 %v3865_v53, %v3402_v52  ;;  %v132_v55 = vpop.f32.mrb[1].mxu1  ;;  %v4100_v53 = vld [vmem:[%s6010_s7 + $0x4] ss:$28 sps:$4 sm:$0xff]  }
  0xdf   :  { %v133_v56 = vadd.f32 %v3402_v52, %v132_v55  ;;  %v3866_v57 = vpop.f32.mrb[2].mxu1  ;;  %v193_v55 = vlaneseq }
  0xe0   :  { %v144_v58 = vadd.f32 %v3866_v57, %v3402_v52  ;;  %v135_v59 = vpop.f32.mrb[3].mxu1  ;;  %v165_v61 = vmax.f32 %v141_v54, 0.0  ;;  %v4103_v54 = vld [vmem:[%s6010_s7 + $0xc] ss:$28 sps:$4 sm:$0xff]  }
  0xe1   :  { %v136_v60 = vadd.f32 %v3402_v52, %v135_v59  ;;  %v163_v63 = vmax.f32 %v133_v56, 0.0  ;;  %v4995_v56 = vshrl.u32 %v193_v55, 7 }
  0xe2   :  { %v166_v62 = vmax.f32 %v144_v58, 0.0  ;;  %v191_v58 = vld [vmem:[%s6007_s4] sm:$0x3] }
  0xe3   :  { %v164_v0 = vmax.f32 %v136_v60, 0.0  ;;  %v4998_v57 = vsub.s32 0, %v4995_v56  ;;  %v5004_v59 = vsub.s32 1, %v4995_v56 }
  0xe4   :  { %v172_v1 = vpack.c.bf16 %v166_v62, %v165_v61 }
  0xe5   :  { %v171_v3 = vpack.c.bf16 %v164_v0, %v163_v63  ;;  %v3869_v4 = vpop.f32.mrb[4].mxu1  ;;  %v5007_v60 = vrot.slane %v191_v58, %v4998_v57  ;;  %v5010_v61 = vrot.slane %v191_v58, %v5004_v59 }
  0xe6   :  { %v157_v6 = vadd.f32 %v3869_v4, %v3402_v52  ;;  %v148_v7 = vpop.f32.mrb[5].mxu1 }
  0xe7   :  { %316 = vmatmul.mubr.bf16.vlgmr.msra.gmra.mrb[8].mxu1 %v171_v3  ;;  %v149_v8 = vadd.f32 %v3402_v52, %v148_v7  ;;  %v3870_v9 = vpop.f32.mrb[6].mxu1 }
  0xe8   :  { %v169_v10 = vmax.f32 %v157_v6, 0.0  ;;  %325 = vmatprep.mubr.bf16.mxu1 %v4666_v23  ;;  %v160_v11 = vadd.f32 %v3870_v9, %v3402_v52  ;;  %v151_v12 = vpop.f32.mrb[7].mxu1  ;;  %860 = vmatpush1.bf16.msra.mxu1 %v4004_v2 }
  0xe9   :  { %v167_v14 = vmax.f32 %v149_v8, 0.0  ;;  %v152_v15 = vadd.f32 %v3402_v52, %v151_v12  ;;  %861 = vmatprep.subr.bf16.mxu1 %v4012_v5  ;;  %v4097_v52 = vld [vmem:[%s6008_s5 + $0x1e0] ss:$16 sps:$4 sm:$0xff]  }
  0xea   :  { %v170_v17 = vmax.f32 %v160_v11, 0.0  ;;  %817 = vmatpush1.bf16.msra.mxu0 %v4097_v52  ;;  %v4127_v52 = vld [vmem:[%s6010_s7 + $0xec] ss:$28 sps:$4 sm:$0xff]  }
  0xeb   :  { %v168_v18 = vmax.f32 %v152_v15, 0.0  ;;  %2425 = vmatprep.subr.bf16.mxu0 %v4100_v53 }
  0xec   :  { %v174_v19 = vpack.c.bf16 %v170_v17, %v169_v10  ;;  %862 = vmatpush1.bf16.msra.mxu1 %v4010_v13  ;;  %v4098_v13 = vld [vmem:[%s6010_s7] ss:$28 sps:$4 sm:$0xff]  }
  0xed   :  { %v173_v21 = vpack.c.bf16 %v168_v18, %v167_v14  ;;  %863 = vmatprep.subr.bf16.mxu1 %v4018_v16  ;;  %v4101_v14 = vld [vmem:[%s6010_s7 + $0x8] ss:$28 sps:$4 sm:$0xff]   ;;  %v4106_v17 = vld [vmem:[%s6010_s7 + $0x3c] ss:$28 sps:$4 sm:$0xff]  }
  0xee   :  { %v4109_v18 = vld [vmem:[%s6010_s7 + $0x44] ss:$28 sps:$4 sm:$0xff]  }
  0xef   :  { %326 = vmatmul.mubr.bf16.gmra.mrb[12].mxu1 %v172_v1 }
  0xf0   :  { %335 = vmatprep.mubr.bf16.mxu1 %v4666_v23  ;;  %864 = vmatpush1.bf16.msra.mxu1 %v4016_v20 }
  0xf1   :  { %865 = vmatprep.subr.bf16.mxu1 %v4024_v22 }
  0xf4   :  { %866 = vmatpush1.bf16.msra.mxu1 %v4022_v24 }
  0xf5   :  { %867 = vmatprep.subr.bf16.mxu1 %v4030_v25  ;;  %v4104_v25 = vld [vmem:[%s6010_s7 + $0x38] ss:$28 sps:$4 sm:$0xff]  }
  0xf7   :  { %336 = vmatmul.mubr.bf16.gmra.mrb[16].mxu1 %v173_v21 }
  0xf8   :  { %345 = vmatprep.mubr.bf16.mxu1 %v4666_v23  ;;  %868 = vmatpush1.bf16.msra.mxu1 %v4028_v26  ;;  %v4048_v23 = vld [vmem:[%s6008_s5 + $0xec] ss:$16 sps:$4 sm:$0xff]  }
  0xf9   :  { %869 = vmatprep.subr.bf16.mxu1 %v4036_v27  ;;  %v4107_v26 = vld [vmem:[%s6010_s7 + $0x40] ss:$28 sps:$4 sm:$0xff]  }
  0xfc   :  { %870 = vmatpush1.bf16.msra.mxu1 %v4034_v28 }
  0xfd   :  { %871 = vmatprep.subr.bf16.mxu1 %v4042_v29  ;;  %v4112_v29 = vld [vmem:[%s6010_s7 + $0x74] ss:$28 sps:$4 sm:$0xff]  }
  0xff   :  { %346 = vmatmul.mubr.bf16.gmra.mrb[20].mxu1 %v174_v19 }
 0x100   :  { %872 = vmatpush1.bf16.msra.mxu1 %v4040_v30  ;;  %v4115_v30 = vld [vmem:[%s6010_s7 + $0x7c] ss:$28 sps:$4 sm:$0xff]  }
 0x101   :  { %873 = vmatprep.subr.bf16.mxu1 %v4048_v23 }
 0x104   :  { %874 = vmatpush1.bf16.msra.mxu1 %v4046_v31 }
 0x105   :  { %875 = vmatprep.subr.bf16.mxu1 %v4054_v32 }
 0x108   :  { %876 = vmatpush1.bf16.msra.mxu1 %v4052_v33 }
 0x109   :  { %877 = vmatprep.subr.bf16.mxu1 %v4060_v34 }
 0x10c   :  { %878 = vmatpush1.bf16.msra.mxu1 %v4058_v35  ;;  %v4110_v35 = vld [vmem:[%s6010_s7 + $0x70] ss:$28 sps:$4 sm:$0xff]  }
 0x10d   :  { %879 = vmatprep.subr.bf16.mxu1 %v4066_v36  ;;  %v4113_v36 = vld [vmem:[%s6010_s7 + $0x78] ss:$28 sps:$4 sm:$0xff]  }
 0x110   :  { %880 = vmatpush1.bf16.msra.mxu1 %v4064_v37 }
 0x111   :  { %881 = vmatprep.subr.bf16.mxu1 %v4072_v38 }
 0x114   :  { %882 = vmatpush1.bf16.msra.mxu1 %v4070_v39  ;;  %v4118_v39 = vld [vmem:[%s6010_s7 + $0xac] ss:$28 sps:$4 sm:$0xff]  }
 0x115   :  { %883 = vmatprep.subr.bf16.mxu1 %v4078_v40  ;;  %v4121_v40 = vld [vmem:[%s6010_s7 + $0xb4] ss:$28 sps:$4 sm:$0xff]  }
 0x118   :  { %884 = vmatpush1.bf16.msra.mxu1 %v4076_v41 }
 0x119   :  { %885 = vmatprep.subr.bf16.mxu1 %v4084_v42 }
 0x11c   :  { %886 = vmatpush1.bf16.msra.mxu1 %v4082_v43 }
 0x11d   :  { %887 = vmatprep.subr.bf16.mxu1 %v4090_v46 }
 0x120   :  { %888 = vmatpush1.bf16.msra.mxu1 %v4088_v47 }
 0x121   :  { %889 = vmatprep.subr.bf16.mxu1 %v4096_v50 }
 0x124   :  { %890 = vmatpush1.bf16.msra.mxu1 %v4094_v51  ;;  %v4124_v51 = vld [vmem:[%s6010_s7 + $0xe4] ss:$28 sps:$4 sm:$0xff]  }
 0x125   :  { %2571 = vmatprep.subr.bf16.mxu1 %v4103_v54 }
 0x1ba   :  { %v317_v62 = vpop.f32.mrb[8].mxu1 }
 0x1bb   :  { %v318_v63 = vadd.f32 %v317_v62, %v5007_v60  ;;  %v319_v0 = vpop.f32.mrb[9].mxu1  ;;  %v4122_v62 = vld [vmem:[%s6010_s7 + $0xe0] ss:$28 sps:$4 sm:$0xff]  }
 0x1bc   :  { %v320_v1 = vadd.f32 %v319_v0, %v5010_v61  ;;  %v321_v2 = vpop.f32.mrb[10].mxu1 }
 0x1bd   :  { %v322_v3 = vadd.f32 %v321_v2, %v5007_v60  ;;  %v323_v4 = vpop.f32.mrb[11].mxu1  ;;  %v356_v6 = vmax.f32 %v318_v63, 0.0  ;;  %v4125_v63 = vld [vmem:[%s6010_s7 + $0xe8] ss:$28 sps:$4 sm:$0xff]   ;;  %v4130_v2 = vld [vmem:[%s6010_s7 + $0x11c] ss:$28 sps:$4 sm:$0xff]  }
 0x1be   :  { %v324_v5 = vadd.f32 %v323_v4, %v5010_v61  ;;  %v357_v8 = vmax.f32 %v320_v1, 0.0 }
 0x1bf   :  { %v358_v7 = vmax.f32 %v322_v3, 0.0  ;;  %v4133_v3 = vld [vmem:[%s6010_s7 + $0x124] ss:$28 sps:$4 sm:$0xff]  }
 0x1c0   :  { %v359_v9 = vmax.f32 %v324_v5, 0.0 }
 0x1c1   :  { %v372_v10 = vpack.c.bf16 %v358_v7, %v356_v6 }
 0x1c2   :  { %v327_v11 = vpop.f32.mrb[12].mxu1  ;;  %v373_v12 = vpack.c.bf16 %v359_v9, %v357_v8 }
 0x1c3   :  { %v328_v15 = vadd.f32 %v327_v11, %v5007_v60  ;;  %v329_v16 = vpop.f32.mrb[13].mxu1  ;;  %v4128_v11 = vld [vmem:[%s6010_s7 + $0x118] ss:$28 sps:$4 sm:$0xff]  }
 0x1c4   :  { %v330_v19 = vadd.f32 %v329_v16, %v5010_v61  ;;  %v331_v20 = vpop.f32.mrb[14].mxu1  ;;  %818 = vmatprep.mubr.bf16.mxu0 %v373_v12  ;;  %891 = vmatprep.mubr.bf16.mxu1 %v373_v12  ;;  %v4131_v12 = vld [vmem:[%s6010_s7 + $0x120] ss:$28 sps:$4 sm:$0xff]  }
 0x1c5   :  { %v332_v21 = vadd.f32 %v331_v20, %v5007_v60  ;;  %v333_v22 = vpop.f32.mrb[15].mxu1  ;;  %819 = vmatmul.mubr.bf16.vlgmr.msra.gmra.mrb[0].mxu0 %v372_v10  ;;  %892 = vmatmul.mubr.bf16.vlgmr.msra.gmra.mrb[24].mxu1 %v372_v10  ;;  %v360_v27 = vmax.f32 %v328_v15, 0.0  ;;  %v4145_v20 = vld [vmem:[%s6010_s7 + $0x194] ss:$28 sps:$4 sm:$0xff]  }
 0x1c6   :  { %v334_v24 = vadd.f32 %v333_v22, %v5010_v61  ;;  %2426 = vmatpush1.bf16.msra.mxu0 %v4098_v13  ;;  %2572 = vmatpush1.bf16.msra.mxu1 %v4101_v14  ;;  %v361_v23 = vmax.f32 %v330_v19, 0.0  ;;  %v4142_v19 = vld [vmem:[%s6010_s7 + $0x18c] ss:$28 sps:$4 sm:$0xff]  }
 0x1c7   :  { %v362_v28 = vmax.f32 %v332_v21, 0.0  ;;  %2427 = vmatprep.subr.bf16.mxu0 %v4106_v17  ;;  %2573 = vmatprep.subr.bf16.mxu1 %v4109_v18  ;;  %v4134_v17 = vld [vmem:[%s6010_s7 + $0x150] ss:$28 sps:$4 sm:$0xff]   ;;  %v4137_v18 = vld [vmem:[%s6010_s7 + $0x158] ss:$28 sps:$4 sm:$0xff]  }
 0x1c8   :  { %v363_v31 = vmax.f32 %v334_v24, 0.0  ;;  %v4140_v21 = vld [vmem:[%s6010_s7 + $0x188] ss:$28 sps:$4 sm:$0xff]   ;;  %v4143_v22 = vld [vmem:[%s6010_s7 + $0x190] ss:$28 sps:$4 sm:$0xff]  }
 0x1c9   :  { %v374_v32 = vpack.c.bf16 %v362_v28, %v360_v27  ;;  %v4148_v24 = vld [vmem:[%s6010_s7 + $0x1c4] ss:$28 sps:$4 sm:$0xff]   ;;  %v4154_v28 = vld [vmem:[%s6010_s7 + $0x1fc] ss:$28 sps:$4 sm:$0xff]  }
 0x1ca   :  { %v375_v33 = vpack.c.bf16 %v363_v31, %v361_v23  ;;  %v337_v34 = vpop.f32.mrb[16].mxu1  ;;  %2428 = vmatpush1.bf16.msra.mxu0 %v4104_v25  ;;  %2574 = vmatpush1.bf16.msra.mxu1 %v4107_v26  ;;  %v4151_v25 = vld [vmem:[%s6010_s7 + $0x1cc] ss:$28 sps:$4 sm:$0xff]   ;;  %v4146_v26 = vld [vmem:[%s6010_s7 + $0x1c0] ss:$28 sps:$4 sm:$0xff]  }
 0x1cb   :  { %v338_v37 = vadd.f32 %v337_v34, %v5007_v60  ;;  %v339_v38 = vpop.f32.mrb[17].mxu1  ;;  %2429 = vmatprep.subr.bf16.mxu0 %v4112_v29  ;;  %2575 = vmatprep.subr.bf16.mxu1 %v4115_v30  ;;  %v4149_v27 = vld [vmem:[%s6010_s7 + $0x1c8] ss:$28 sps:$4 sm:$0xff]   ;;  %v4152_v30 = vld [vmem:[%s6010_s7 + $0x1f8] ss:$28 sps:$4 sm:$0xff]  }
 0x1cc   :  { %v340_v41 = vadd.f32 %v339_v38, %v5010_v61  ;;  %v341_v42 = vpop.f32.mrb[18].mxu1  ;;  %828 = vmatprep.mubr.bf16.mxu0 %v375_v33  ;;  %901 = vmatprep.mubr.bf16.mxu1 %v375_v33  ;;  %v4157_v29 = vld [vmem:[%s6010_s7 + $0x204] ss:$28 sps:$4 sm:$0xff]   ;;  %v4160_v31 = vld [vmem:[%s6010_s7 + $0x234] ss:$28 sps:$4 sm:$0xff]  }
 0x1cd   :  { %v364_v43 = vmax.f32 %v338_v37, 0.0  ;;  %v342_v44 = vadd.f32 %v341_v42, %v5007_v60  ;;  %v343_v45 = vpop.f32.mrb[19].mxu1  ;;  %829 = vmatmul.mubr.bf16.gmra.mrb[4].mxu0 %v374_v32  ;;  %902 = vmatmul.mubr.bf16.gmra.mrb[28].mxu1 %v374_v32  ;;  %v4155_v23 = vld [vmem:[%s6010_s7 + $0x200] ss:$28 sps:$4 sm:$0xff]   ;;  %v4158_v33 = vld [vmem:[%s6010_s7 + $0x230] ss:$28 sps:$4 sm:$0xff]  }
 0x1ce   :  { %v365_v46 = vmax.f32 %v340_v41, 0.0  ;;  %v344_v47 = vadd.f32 %v343_v45, %v5010_v61  ;;  %2430 = vmatpush1.bf16.msra.mxu0 %v4110_v35  ;;  %2576 = vmatpush1.bf16.msra.mxu1 %v4113_v36  ;;  %v4163_v32 = vld [vmem:[%s6010_s7 + $0x23c] ss:$28 sps:$4 sm:$0xff]   ;;  %v4166_v35 = vld [vmem:[%s6010_s7 + $0x26c] ss:$28 sps:$4 sm:$0xff]  }
 0x1cf   :  { %v366_v50 = vmax.f32 %v342_v44, 0.0  ;;  %2431 = vmatprep.subr.bf16.mxu0 %v4118_v39  ;;  %2577 = vmatprep.subr.bf16.mxu1 %v4121_v40  ;;  %v4161_v34 = vld [vmem:[%s6010_s7 + $0x238] ss:$28 sps:$4 sm:$0xff]   ;;  %v4164_v37 = vld [vmem:[%s6010_s7 + $0x268] ss:$28 sps:$4 sm:$0xff]  }
 0x1d0   :  { %v367_v53 = vmax.f32 %v344_v47, 0.0  ;;  %v4169_v36 = vld [vmem:[%s6010_s7 + $0x274] ss:$28 sps:$4 sm:$0xff]   ;;  %v4172_v39 = vld [vmem:[%s6010_s7 + $0x2a4] ss:$28 sps:$4 sm:$0xff]  }
 0x1d1   :  { %v376_v54 = vpack.c.bf16 %v366_v50, %v364_v43  ;;  %v4167_v38 = vld [vmem:[%s6010_s7 + $0x270] ss:$28 sps:$4 sm:$0xff]   ;;  %v4170_v41 = vld [vmem:[%s6010_s7 + $0x2a0] ss:$28 sps:$4 sm:$0xff]   ;;  %v4173_v42 = vld [vmem:[%s6010_s7 + $0x2a8] ss:$28 sps:$4 sm:$0xff]  }
 0x1d2   :  { %v377_v55 = vpack.c.bf16 %v367_v53, %v365_v46  ;;  %v347_v58 = vpop.f32.mrb[20].mxu1  ;;  %2432 = vmatpush1.bf16.msra.mxu0 %v4116_v48  ;;  %2578 = vmatpush1.bf16.msra.mxu1 %v4119_v49  ;;  %v4175_v40 = vld [vmem:[%s6010_s7 + $0x2ac] ss:$28 sps:$4 sm:$0xff]   ;;  %v4178_v43 = vld [vmem:[%s6010_s7 + $0x2dc] ss:$28 sps:$4 sm:$0xff]  }
 0x1d3   :  { %v348_v0 = vadd.f32 %v347_v58, %v5007_v60  ;;  %v349_v1 = vpop.f32.mrb[21].mxu1  ;;  %2433 = vmatprep.subr.bf16.mxu0 %v4124_v51  ;;  %2579 = vmatprep.subr.bf16.mxu1 %v4127_v52  ;;  %v4181_v44 = vld [vmem:[%s6010_s7 + $0x2e4] ss:$28 sps:$4 sm:$0xff]   ;;  %v4176_v45 = vld [vmem:[%s6010_s7 + $0x2d8] ss:$28 sps:$4 sm:$0xff]  }
 0x1d4   :  { %v350_v4 = vadd.f32 %v349_v1, %v5010_v61  ;;  %v351_v5 = vpop.f32.mrb[22].mxu1  ;;  %838 = vmatprep.mubr.bf16.mxu0 %v377_v55  ;;  %911 = vmatprep.mubr.bf16.mxu1 %v377_v55  ;;  %v4179_v46 = vld [vmem:[%s6010_s7 + $0x2e0] ss:$28 sps:$4 sm:$0xff]   ;;  %v4184_v47 = vld [vmem:[%s6010_s7 + $0x314] ss:$28 sps:$4 sm:$0xff]  }
 0x1d5   :  { %v368_v6 = vmax.f32 %v348_v0, 0.0  ;;  %v352_v7 = vadd.f32 %v351_v5, %v5007_v60  ;;  %v353_v8 = vpop.f32.mrb[23].mxu1  ;;  %839 = vmatmul.mubr.bf16.gmra.mrb[8].mxu0 %v376_v54  ;;  %912 = vmatmul.mubr.bf16.gmra.mrb[32].mxu1 %v376_v54  ;;  %v4136_v60 = vld [vmem:[%s6010_s7 + $0x154] ss:$28 sps:$4 sm:$0xff]   ;;  %v4187_v48 = vld [vmem:[%s6010_s7 + $0x31c] ss:$28 sps:$4 sm:$0xff]  }
 0x1d6   :  { %v369_v9 = vmax.f32 %v350_v4, 0.0  ;;  %v354_v10 = vadd.f32 %v353_v8, %v5010_v61  ;;  %2434 = vmatpush1.bf16.msra.mxu0 %v4122_v62  ;;  %2580 = vmatpush1.bf16.msra.mxu1 %v4125_v63  ;;  %v4139_v61 = vld [vmem:[%s6010_s7 + $0x15c] ss:$28 sps:$4 sm:$0xff]   ;;  %v4182_v49 = vld [vmem:[%s6010_s7 + $0x310] ss:$28 sps:$4 sm:$0xff]   ;;  %v456_v62 = vsub.s32 2, %v4995_v56 }
 0x1d7   :  { %v370_v13 = vmax.f32 %v352_v7, 0.0  ;;  %2435 = vmatprep.subr.bf16.mxu0 %v4130_v2  ;;  %2581 = vmatprep.subr.bf16.mxu1 %v4133_v3  ;;  %v4185_v50 = vld [vmem:[%s6010_s7 + $0x318] ss:$28 sps:$4 sm:$0xff]   ;;  %v4190_v51 = vld [vmem:[%s6010_s7 + $0x34c] ss:$28 sps:$4 sm:$0xff]   ;;  %v460_v0 = vsub.s32 3, %v4995_v56 }
 0x1d8   :  { %v371_v14 = vmax.f32 %v354_v10, 0.0  ;;  %v4193_v52 = vld [vmem:[%s6010_s7 + $0x354] ss:$28 sps:$4 sm:$0xff]   ;;  %v4188_v53 = vld [vmem:[%s6010_s7 + $0x348] ss:$28 sps:$4 sm:$0xff]  }
 0x1d9   :  { %v378_v15 = vpack.c.bf16 %v370_v13, %v368_v6  ;;  %v4191_v54 = vld [vmem:[%s6010_s7 + $0x350] ss:$28 sps:$4 sm:$0xff]   ;;  %v4196_v55 = vld [vmem:[%s6010_s7 + $0x384] ss:$28 sps:$4 sm:$0xff]  }
 0x1da   :  { %v379_v16 = vpack.c.bf16 %v371_v14, %v369_v9  ;;  %2436 = vmatpush1.bf16.msra.mxu0 %v4128_v11  ;;  %2582 = vmatpush1.bf16.msra.mxu1 %v4131_v12  ;;  %v4199_v58 = vld [vmem:[%s6010_s7 + $0x38c] ss:$28 sps:$4 sm:$0xff]   ;;  %v444_v63 = vld [vmem:[%s6009_s6] sm:$0xf] }
 0x1db   :  { %2437 = vmatprep.subr.bf16.mxu0 %v4136_v60  ;;  %2583 = vmatprep.subr.bf16.mxu1 %v4139_v61  ;;  %v5226_v1 = vrot.slane %v444_v63, %v4998_v57  ;;  %v5230_v2 = vrot.slane %v444_v63, %v456_v62  ;;  %v5233_v3 = vrot.slane %v444_v63, %v5004_v59 }
 0x1dc   :  { %848 = vmatprep.mubr.bf16.mxu0 %v379_v16  ;;  %921 = vmatprep.mubr.bf16.mxu1 %v379_v16  ;;  %v5237_v4 = vrot.slane %v444_v63, %v460_v0 }
 0x1dd   :  { %849 = vmatmul.mubr.bf16.gmra.mrb[12].mxu0 %v378_v15  ;;  %922 = vmatmul.mubr.bf16.gmra.mrb[36].mxu1 %v378_v15 }
 0x1de   :  { %2438 = vmatpush1.bf16.msra.mxu0 %v4134_v17  ;;  %2584 = vmatpush1.bf16.msra.mxu1 %v4137_v18 }
 0x1df   :  { %2439 = vmatprep.subr.bf16.mxu0 %v4142_v19  ;;  %2585 = vmatprep.subr.bf16.mxu1 %v4145_v20 }
 0x1e2   :  { %2440 = vmatpush1.bf16.msra.mxu0 %v4140_v21  ;;  %2586 = vmatpush1.bf16.msra.mxu1 %v4143_v22 }
 0x1e3   :  { %2441 = vmatprep.subr.bf16.mxu0 %v4148_v24  ;;  %2587 = vmatprep.subr.bf16.mxu1 %v4151_v25 }
 0x1e6   :  { %2442 = vmatpush1.bf16.msra.mxu0 %v4146_v26  ;;  %2588 = vmatpush1.bf16.msra.mxu1 %v4149_v27 }
 0x1e7   :  { %2443 = vmatprep.subr.bf16.mxu0 %v4154_v28  ;;  %2589 = vmatprep.subr.bf16.mxu1 %v4157_v29 }
 0x1ea   :  { %2444 = vmatpush1.bf16.msra.mxu0 %v4152_v30  ;;  %2590 = vmatpush1.bf16.msra.mxu1 %v4155_v23 }
 0x1eb   :  { %2445 = vmatprep.subr.bf16.mxu0 %v4160_v31  ;;  %2591 = vmatprep.subr.bf16.mxu1 %v4163_v32 }
 0x1ee   :  { %2446 = vmatpush1.bf16.msra.mxu0 %v4158_v33  ;;  %2592 = vmatpush1.bf16.msra.mxu1 %v4161_v34  ;;  %v4194_v33 = vld [vmem:[%s6010_s7 + $0x380] ss:$28 sps:$4 sm:$0xff]   ;;  %v4197_v34 = vld [vmem:[%s6010_s7 + $0x388] ss:$28 sps:$4 sm:$0xff]  }
 0x1ef   :  { %2447 = vmatprep.subr.bf16.mxu0 %v4166_v35  ;;  %2593 = vmatprep.subr.bf16.mxu1 %v4169_v36 }
 0x1f2   :  { %2448 = vmatpush1.bf16.msra.mxu0 %v4164_v37  ;;  %2594 = vmatpush1.bf16.msra.mxu1 %v4167_v38 }
 0x1f3   :  { %2449 = vmatprep.subr.bf16.mxu0 %v4172_v39  ;;  %2595 = vmatprep.subr.bf16.mxu1 %v4175_v40  ;;  %v4202_v39 = vld [vmem:[%s6010_s7 + $0x3bc] ss:$28 sps:$4 sm:$0xff]   ;;  %v4205_v40 = vld [vmem:[%s6010_s7 + $0x3c4] ss:$28 sps:$4 sm:$0xff]  }
 0x1f6   :  { %2450 = vmatpush1.bf16.msra.mxu0 %v4170_v41  ;;  %2596 = vmatpush1.bf16.msra.mxu1 %v4173_v42 }
 0x1f7   :  { %2451 = vmatprep.subr.bf16.mxu0 %v4178_v43  ;;  %2597 = vmatprep.subr.bf16.mxu1 %v4181_v44 }
 0x1fa   :  { %2452 = vmatpush1.bf16.msra.mxu0 %v4176_v45  ;;  %2598 = vmatpush1.bf16.msra.mxu1 %v4179_v46 }
 0x1fb   :  { %2453 = vmatprep.subr.bf16.mxu0 %v4184_v47  ;;  %2599 = vmatprep.subr.bf16.mxu1 %v4187_v48 }
 0x1fe   :  { %2454 = vmatpush1.bf16.msra.mxu0 %v4182_v49  ;;  %2600 = vmatpush1.bf16.msra.mxu1 %v4185_v50 }
 0x1ff   :  { %2455 = vmatprep.subr.bf16.mxu0 %v4190_v51  ;;  %2601 = vmatprep.subr.bf16.mxu1 %v4193_v52  ;;  %v4200_v51 = vld [vmem:[%s6010_s7 + $0x3b8] ss:$28 sps:$4 sm:$0xff]   ;;  %v4203_v52 = vld [vmem:[%s6010_s7 + $0x3c0] ss:$28 sps:$4 sm:$0xff]  }
 0x202   :  { %2456 = vmatpush1.bf16.msra.mxu0 %v4188_v53  ;;  %2602 = vmatpush1.bf16.msra.mxu1 %v4191_v54  ;;  %v4208_v53 = vld [vmem:[%s6010_s7 + $0x3f4] ss:$28 sps:$4 sm:$0xff]  }
 0x203   :  { %2498 = vmatprep.subr.bf16.mxu0 %v4196_v55  ;;  %2644 = vmatprep.subr.bf16.mxu1 %v4199_v58 }
 0x298   :  { %v820_v5 = vpop.f32.mrb[0].mxu0  ;;  %v893_v6 = vpop.f32.mrb[24].mxu1 }
 0x299   :  { %v821_v7 = vadd.f32 %v820_v5, %v5226_v1  ;;  %v894_v8 = vadd.f32 %v893_v6, %v5230_v2  ;;  %v822_v9 = vpop.f32.mrb[1].mxu0  ;;  %v895_v10 = vpop.f32.mrb[25].mxu1  ;;  %v4211_v5 = vld [vmem:[%s6010_s7 + $0x3fc] ss:$28 sps:$4 sm:$0xff]  }
 0x29a   :  { %v823_v11 = vadd.f32 %v822_v9, %v5233_v3  ;;  %v896_v12 = vadd.f32 %v895_v10, %v5237_v4  ;;  %v824_v13 = vpop.f32.mrb[2].mxu0  ;;  %v897_v60 = vpop.f32.mrb[26].mxu1 }
 0x29b   :  { %v825_v61 = vadd.f32 %v824_v13, %v5226_v1  ;;  %v898_v14 = vadd.f32 %v897_v60, %v5230_v2  ;;  %v826_v15 = vpop.f32.mrb[3].mxu0  ;;  %v899_v16 = vpop.f32.mrb[27].mxu1  ;;  %v932_v19 = vmax.f32 %v821_v7, 0.0  ;;  %v934_v20 = vmax.f32 %v894_v8, 0.0 }
 0x29c   :  { %v827_v17 = vadd.f32 %v826_v15, %v5233_v3  ;;  %v900_v18 = vadd.f32 %v899_v16, %v5237_v4  ;;  %v933_v24 = vmax.f32 %v823_v11, 0.0  ;;  %v935_v25 = vmax.f32 %v896_v12, 0.0 }
 0x29d   :  { %v936_v21 = vmax.f32 %v825_v61, 0.0  ;;  %v938_v22 = vmax.f32 %v898_v14, 0.0  ;;  %v4206_v61 = vld [vmem:[%s6010_s7 + $0x3f0] ss:$28 sps:$4 sm:$0xff]   ;;  %v4209_v14 = vld [vmem:[%s6010_s7 + $0x3f8] ss:$28 sps:$4 sm:$0xff]  }
 0x29e   :  { %v937_v26 = vmax.f32 %v827_v17, 0.0  ;;  %v939_v27 = vmax.f32 %v900_v18, 0.0  ;;  %v4214_v18 = vld [vmem:[%s6010_s7 + $0x42c] ss:$28 sps:$4 sm:$0xff]  }
 0x29f   :  { %v5247_v28 = vpack.c.bf16 %v936_v21, %v932_v19  ;;  %v5249_v29 = vpack.c.bf16 %v938_v22, %v934_v20  ;;  %v4217_v19 = vld [vmem:[%s6010_s7 + $0x434] ss:$28 sps:$4 sm:$0xff]  }
 0x2a0   :  { %v5251_v30 = vpack.c.bf16 %v937_v26, %v933_v24  ;;  %v5253_v23 = vpack.c.bf16 %v939_v27, %v935_v25  ;;  %v830_v31 = vpop.f32.mrb[4].mxu0  ;;  %v903_v32 = vpop.f32.mrb[28].mxu1 }
 0x2a1   :  { %v831_v35 = vadd.f32 %v830_v31, %v5226_v1  ;;  %v904_v36 = vadd.f32 %v903_v32, %v5230_v2  ;;  %v832_v37 = vpop.f32.mrb[5].mxu0  ;;  %v905_v38 = vpop.f32.mrb[29].mxu1 }
 0x2a2   :  { %v833_v41 = vadd.f32 %v832_v37, %v5233_v3  ;;  %v906_v42 = vadd.f32 %v905_v38, %v5237_v4  ;;  %v834_v43 = vpop.f32.mrb[6].mxu0  ;;  %v907_v44 = vpop.f32.mrb[30].mxu1  ;;  %2457 = vmatprep.mubr.bf16.mxu0 %v5251_v30  ;;  %2603 = vmatprep.mubr.bf16.mxu1 %v5251_v30  ;;  %v4212_v38 = vld [vmem:[%s6010_s7 + $0x428] ss:$28 sps:$4 sm:$0xff]  }
 0x2a3   :  { %v835_v45 = vadd.f32 %v834_v43, %v5226_v1  ;;  %v908_v46 = vadd.f32 %v907_v44, %v5230_v2  ;;  %v836_v47 = vpop.f32.mrb[7].mxu0  ;;  %v909_v48 = vpop.f32.mrb[31].mxu1  ;;  %2458 = vmatmul.mubr.bf16.vlgmr.msra.gmra.mrb[16].mxu0 %v5247_v28  ;;  %2604 = vmatmul.mubr.bf16.vlgmr.msra.gmra.mrb[40].mxu1 %v5247_v28  ;;  %v940_v54 = vmax.f32 %v831_v35, 0.0  ;;  %v942_v55 = vmax.f32 %v904_v36, 0.0  ;;  %v4220_v43 = vld [vmem:[%s6010_s7 + $0x464] ss:$28 sps:$4 sm:$0xff]  }
 0x2a4   :  { %v837_v49 = vadd.f32 %v836_v47, %v5233_v3  ;;  %v910_v50 = vadd.f32 %v909_v48, %v5237_v4  ;;  %2499 = vmatpush1.bf16.msra.mxu0 %v4194_v33  ;;  %2645 = vmatpush1.bf16.msra.mxu1 %v4197_v34  ;;  %v941_v6 = vmax.f32 %v833_v41, 0.0  ;;  %v943_v7 = vmax.f32 %v906_v42, 0.0  ;;  %v4223_v44 = vld [vmem:[%s6010_s7 + $0x46c] ss:$28 sps:$4 sm:$0xff]  }
 0x2a5   :  { %v944_v58 = vmax.f32 %v835_v45, 0.0  ;;  %v946_v63 = vmax.f32 %v908_v46, 0.0  ;;  %2500 = vmatprep.subr.bf16.mxu0 %v4202_v39  ;;  %2646 = vmatprep.subr.bf16.mxu1 %v4205_v40  ;;  %v4215_v39 = vld [vmem:[%s6010_s7 + $0x430] ss:$28 sps:$4 sm:$0xff]  }
 0x2a6   :  { %v945_v8 = vmax.f32 %v837_v49, 0.0  ;;  %v947_v9 = vmax.f32 %v910_v50, 0.0 }
 0x2a7   :  { %v5291_v10 = vpack.c.bf16 %v944_v58, %v940_v54  ;;  %v5293_v11 = vpack.c.bf16 %v946_v63, %v942_v55 }
 0x2a8   :  { %v5295_v12 = vpack.c.bf16 %v945_v8, %v941_v6  ;;  %v5297_v13 = vpack.c.bf16 %v947_v9, %v943_v7  ;;  %2501 = vmatpush1.bf16.msra.mxu0 %v4200_v51  ;;  %2647 = vmatpush1.bf16.msra.mxu1 %v4203_v52  ;;  %v840_v60 = vpop.f32.mrb[8].mxu0  ;;  %v913_v15 = vpop.f32.mrb[32].mxu1  ;;  %v4218_v52 = vld [vmem:[%s6010_s7 + $0x460] ss:$28 sps:$4 sm:$0xff]  }
 0x2a9   :  { %v841_v16 = vadd.f32 %v840_v60, %v5226_v1  ;;  %v842_v17 = vpop.f32.mrb[9].mxu0  ;;  %2502 = vmatprep.subr.bf16.mxu0 %v4208_v53  ;;  %2648 = vmatprep.subr.bf16.mxu1 %v4211_v5  ;;  %v914_v20 = vadd.f32 %v913_v15, %v5230_v2  ;;  %v915_v21 = vpop.f32.mrb[33].mxu1  ;;  %v4221_v53 = vld [vmem:[%s6010_s7 + $0x468] ss:$28 sps:$4 sm:$0xff]   ;;  %v4226_v5 = vld [vmem:[%s6010_s7 + $0x49c] ss:$28 sps:$4 sm:$0xff]  }
 0x2aa   :  { %v843_v22 = vadd.f32 %v842_v17, %v5233_v3  ;;  %v844_v24 = vpop.f32.mrb[10].mxu0  ;;  %2467 = vmatprep.mubr.bf16.mxu0 %v5295_v12  ;;  %2613 = vmatprep.mubr.bf16.mxu1 %v5295_v12  ;;  %v916_v25 = vadd.f32 %v915_v21, %v5237_v4  ;;  %v917_v26 = vpop.f32.mrb[34].mxu1  ;;  %v4229_v6 = vld [vmem:[%s6010_s7 + $0x4a4] ss:$28 sps:$4 sm:$0xff]  }
 0x2ab   :  { %v948_v27 = vmax.f32 %v841_v16, 0.0  ;;  %v845_v31 = vadd.f32 %v844_v24, %v5226_v1  ;;  %v846_v32 = vpop.f32.mrb[11].mxu0  ;;  %2468 = vmatmul.mubr.bf16.gmra.mrb[20].mxu0 %v5291_v10  ;;  %2614 = vmatmul.mubr.bf16.gmra.mrb[44].mxu1 %v5291_v10  ;;  %v950_v33 = vmax.f32 %v914_v20, 0.0  ;;  %v918_v34 = vadd.f32 %v917_v26, %v5230_v2  ;;  %v919_v35 = vpop.f32.mrb[35].mxu1  ;;  %v4224_v24 = vld [vmem:[%s6010_s7 + $0x498] ss:$28 sps:$4 sm:$0xff]  }
 0x2ac   :  { %v949_v36 = vmax.f32 %v843_v22, 0.0  ;;  %v847_v37 = vadd.f32 %v846_v32, %v5233_v3  ;;  %2503 = vmatpush1.bf16.msra.mxu0 %v4206_v61  ;;  %2649 = vmatpush1.bf16.msra.mxu1 %v4209_v14  ;;  %v951_v40 = vmax.f32 %v916_v25, 0.0  ;;  %v920_v41 = vadd.f32 %v919_v35, %v5237_v4 }
 0x2ad   :  { %v952_v42 = vmax.f32 %v845_v31, 0.0  ;;  %2504 = vmatprep.subr.bf16.mxu0 %v4214_v18  ;;  %2650 = vmatprep.subr.bf16.mxu1 %v4217_v19  ;;  %v954_v45 = vmax.f32 %v918_v34, 0.0 }
 0x2ae   :  { %v953_v46 = vmax.f32 %v847_v37, 0.0  ;;  %v955_v47 = vmax.f32 %v920_v41, 0.0  ;;  %v4233_v37 = vld [vmem:[%s6010_s7 + $0x4d8] ss:$28 sps:$4 sm:$0xff]   ;;  %v4236_v41 = vld [vmem:[%s6010_s7 + $0x508] ss:$28 sps:$4 sm:$0xff]  }
 0x2af   :  { %v5335_v48 = vpack.c.bf16 %v952_v42, %v948_v27  ;;  %v5337_v49 = vpack.c.bf16 %v954_v45, %v950_v33  ;;  %v4239_v42 = vld [vmem:[%s6010_s7 + $0x510] ss:$28 sps:$4 sm:$0xff]   ;;  %v4242_v45 = vld [vmem:[%s6010_s7 + $0x540] ss:$28 sps:$4 sm:$0xff]  }
 0x2b0   :  { %v5339_v50 = vpack.c.bf16 %v953_v46, %v949_v36  ;;  %2505 = vmatpush1.bf16.msra.mxu0 %v4212_v38  ;;  %2651 = vmatpush1.bf16.msra.mxu1 %v4215_v39  ;;  %v850_v51 = vpop.f32.mrb[12].mxu0  ;;  %v5347_v54 = vpack.c.bf16 %v955_v47, %v951_v40  ;;  %v923_v55 = vpop.f32.mrb[36].mxu1  ;;  %v4238_v39 = vld [vmem:[%s6010_s7 + $0x50c] ss:$28 sps:$4 sm:$0xff]   ;;  %v4241_v40 = vld [vmem:[%s6010_s7 + $0x514] ss:$28 sps:$4 sm:$0xff]  }
 0x2b1   :  { %v851_v58 = vadd.f32 %v850_v51, %v5226_v1  ;;  %v852_v63 = vpop.f32.mrb[13].mxu0  ;;  %2506 = vmatprep.subr.bf16.mxu0 %v4220_v43  ;;  %2652 = vmatprep.subr.bf16.mxu1 %v4223_v44  ;;  %v924_v7 = vadd.f32 %v923_v55, %v5230_v2  ;;  %v925_v8 = vpop.f32.mrb[37].mxu1  ;;  %v4244_v43 = vld [vmem:[%s6010_s7 + $0x544] ss:$28 sps:$4 sm:$0xff]   ;;  %v4247_v44 = vld [vmem:[%s6010_s7 + $0x54c] ss:$28 sps:$4 sm:$0xff]  }
 0x2b2   :  { %v853_v9 = vadd.f32 %v852_v63, %v5233_v3  ;;  %v854_v60 = vpop.f32.mrb[14].mxu0  ;;  %2477 = vmatprep.mubr.bf16.mxu0 %v5339_v50  ;;  %2623 = vmatprep.mubr.bf16.mxu1 %v5339_v50  ;;  %v926_v61 = vadd.f32 %v925_v8, %v5237_v4  ;;  %v927_v14 = vpop.f32.mrb[38].mxu1  ;;  %v4245_v46 = vld [vmem:[%s6010_s7 + $0x548] ss:$28 sps:$4 sm:$0xff]   ;;  %v4250_v47 = vld [vmem:[%s6010_s7 + $0x57c] ss:$28 sps:$4 sm:$0xff]  }
 0x2b3   :  { %v956_v15 = vmax.f32 %v851_v58, 0.0  ;;  %v855_v16 = vadd.f32 %v854_v60, %v5226_v1  ;;  %v856_v17 = vpop.f32.mrb[15].mxu0  ;;  %2478 = vmatmul.mubr.bf16.gmra.mrb[24].mxu0 %v5335_v48  ;;  %2624 = vmatmul.mubr.bf16.gmra.mrb[48].mxu1 %v5335_v48  ;;  %v958_v18 = vmax.f32 %v924_v7, 0.0  ;;  %v928_v19 = vadd.f32 %v927_v14, %v5230_v2  ;;  %v929_v20 = vpop.f32.mrb[39].mxu1  ;;  %v4227_v1 = vld [vmem:[%s6010_s7 + $0x4a0] ss:$28 sps:$4 sm:$0xff]  }
 0x2b4   :  { %v957_v21 = vmax.f32 %v853_v9, 0.0  ;;  %v857_v22 = vadd.f32 %v856_v17, %v5233_v3  ;;  %2507 = vmatpush1.bf16.msra.mxu0 %v4218_v52  ;;  %2653 = vmatpush1.bf16.msra.mxu1 %v4221_v53  ;;  %v959_v25 = vmax.f32 %v926_v61, 0.0  ;;  %v930_v26 = vadd.f32 %v929_v20, %v5237_v4  ;;  %v4232_v2 = vld [vmem:[%s6010_s7 + $0x4d4] ss:$28 sps:$4 sm:$0xff]   ;;  %v4235_v3 = vld [vmem:[%s6010_s7 + $0x4dc] ss:$28 sps:$4 sm:$0xff]  }
 0x2b5   :  { %v960_v27 = vmax.f32 %v855_v16, 0.0  ;;  %2508 = vmatprep.subr.bf16.mxu0 %v4226_v5  ;;  %2654 = vmatprep.subr.bf16.mxu1 %v4229_v6  ;;  %v962_v31 = vmax.f32 %v928_v19, 0.0  ;;  %v4230_v4 = vld [vmem:[%s6010_s7 + $0x4d0] ss:$28 sps:$4 sm:$0xff]   ;;  %v4253_v51 = vld [vmem:[%s6010_s7 + $0x584] ss:$28 sps:$4 sm:$0xff]  }
 0x2b6   :  { %v961_v32 = vmax.f32 %v857_v22, 0.0  ;;  %v963_v33 = vmax.f32 %v930_v26, 0.0  ;;  %v4248_v52 = vld [vmem:[%s6010_s7 + $0x578] ss:$28 sps:$4 sm:$0xff]   ;;  %v4251_v53 = vld [vmem:[%s6010_s7 + $0x580] ss:$28 sps:$4 sm:$0xff]  }
 0x2b7   :  { %v5379_v34 = vpack.c.bf16 %v960_v27, %v956_v15  ;;  %v5381_v35 = vpack.c.bf16 %v962_v31, %v958_v18  ;;  %v4256_v55 = vld [vmem:[%s6010_s7 + $0x5b4] ss:$28 sps:$4 sm:$0xff]   ;;  %v4259_v58 = vld [vmem:[%s6010_s7 + $0x5bc] ss:$28 sps:$4 sm:$0xff]   ;;  %v4262_v6 = vld [vmem:[%s6010_s7 + $0x5ec] ss:$28 sps:$4 sm:$0xff]  }
 0x2b8   :  { %v5383_v36 = vpack.c.bf16 %v961_v32, %v957_v21  ;;  %2509 = vmatpush1.bf16.msra.mxu0 %v4224_v24  ;;  %2655 = vmatpush1.bf16.msra.mxu1 %v4227_v1  ;;  %v5391_v38 = vpack.c.bf16 %v963_v33, %v959_v25  ;;  %v4254_v63 = vld [vmem:[%s6010_s7 + $0x5b0] ss:$28 sps:$4 sm:$0xff]   ;;  %v4257_v5 = vld [vmem:[%s6010_s7 + $0x5b8] ss:$28 sps:$4 sm:$0xff]   ;;  %v4260_v8 = vld [vmem:[%s6010_s7 + $0x5e8] ss:$28 sps:$4 sm:$0xff]  }
 0x2b9   :  { %2510 = vmatprep.subr.bf16.mxu0 %v4232_v2  ;;  %2656 = vmatprep.subr.bf16.mxu1 %v4235_v3  ;;  %v4265_v7 = vld [vmem:[%s6010_s7 + $0x5f4] ss:$28 sps:$4 sm:$0xff]   ;;  %v4268_v60 = vld [vmem:[%s6010_s7 + $0x624] ss:$28 sps:$4 sm:$0xff]   ;;  %v4271_v61 = vld [vmem:[%s6010_s7 + $0x62c] ss:$28 sps:$4 sm:$0xff]  }
 0x2ba   :  { %2487 = vmatprep.mubr.bf16.mxu0 %v5383_v36  ;;  %2633 = vmatprep.mubr.bf16.mxu1 %v5383_v36  ;;  %v4263_v9 = vld [vmem:[%s6010_s7 + $0x5f0] ss:$28 sps:$4 sm:$0xff]   ;;  %v4266_v14 = vld [vmem:[%s6010_s7 + $0x620] ss:$28 sps:$4 sm:$0xff]   ;;  %v4269_v15 = vld [vmem:[%s6010_s7 + $0x628] ss:$28 sps:$4 sm:$0xff]  }
 0x2bb   :  { %2488 = vmatmul.mubr.bf16.gmra.mrb[28].mxu0 %v5379_v34  ;;  %2634 = vmatmul.mubr.bf16.gmra.mrb[52].mxu1 %v5379_v34  ;;  %v4274_v16 = vld [vmem:[%s6010_s7 + $0x65c] ss:$28 sps:$4 sm:$0xff]   ;;  %v4277_v17 = vld [vmem:[%s6010_s7 + $0x664] ss:$28 sps:$4 sm:$0xff]   ;;  %v4280_v20 = vld [vmem:[%s6010_s7 + $0x694] ss:$28 sps:$4 sm:$0xff]  }
 0x2bc   :  { %2511 = vmatpush1.bf16.msra.mxu0 %v4230_v4  ;;  %2657 = vmatpush1.bf16.msra.mxu1 %v4233_v37  ;;  %v4272_v18 = vld [vmem:[%s6010_s7 + $0x658] ss:$28 sps:$4 sm:$0xff]   ;;  %v4275_v19 = vld [vmem:[%s6010_s7 + $0x660] ss:$28 sps:$4 sm:$0xff]   ;;  %v4278_v22 = vld [vmem:[%s6010_s7 + $0x690] ss:$28 sps:$4 sm:$0xff]  }
 0x2bd   :  { %2530 = vmatprep.mubr.bf16.mxu0 %v5253_v23  ;;  %2676 = vmatprep.mubr.bf16.mxu1 %v5253_v23  ;;  %v4283_v21 = vld [vmem:[%s6010_s7 + $0x69c] ss:$28 sps:$4 sm:$0xff]   ;;  %v4286_v1 = vld [vmem:[%s6010_s7 + $0x6cc] ss:$28 sps:$4 sm:$0xff]   ;;  %v4289_v25 = vld [vmem:[%s6010_s7 + $0x6d4] ss:$28 sps:$4 sm:$0xff]  }
 0x2be   :  { %2512 = vmatprep.subr.bf16.mxu0 %v4238_v39  ;;  %2658 = vmatprep.subr.bf16.mxu1 %v4241_v40  ;;  %v4281_v24 = vld [vmem:[%s6010_s7 + $0x698] ss:$28 sps:$4 sm:$0xff]   ;;  %v4284_v26 = vld [vmem:[%s6010_s7 + $0x6c8] ss:$28 sps:$4 sm:$0xff]   ;;  %v4287_v27 = vld [vmem:[%s6010_s7 + $0x6d0] ss:$28 sps:$4 sm:$0xff]  }
 0x2bf   :  { %v4292_v2 = vld [vmem:[%s6010_s7 + $0x14] ss:$28 sps:$4 sm:$0xff]   ;;  %v4297_v33 = vld [vmem:[%s6010_s7 + $0x4c] ss:$28 sps:$4 sm:$0xff]   ;;  %v4302_v40 = vld [vmem:[%s6010_s7 + $0x84] ss:$28 sps:$4 sm:$0xff]  }
 0x2c0   :  { %2513 = vmatpush1.bf16.msra.mxu0 %v4236_v41  ;;  %2659 = vmatpush1.bf16.msra.mxu1 %v4239_v42  ;;  %v4293_v3 = vld [vmem:[%s6010_s7 + $0x1d8] ss:$28 sps:$4 sm:$0xff]   ;;  %v4290_v31 = vld [vmem:[%s6010_s7 + $0x10] ss:$28 sps:$4 sm:$0xff]   ;;  %v4295_v37 = vld [vmem:[%s6010_s7 + $0x48] ss:$28 sps:$4 sm:$0xff]  }
 0x2c1   :  { %2514 = vmatprep.subr.bf16.mxu0 %v4244_v43  ;;  %2660 = vmatprep.subr.bf16.mxu1 %v4247_v44  ;;  %v4294_v32 = vld [vmem:[%s6010_s7 + $0x18] ss:$28 sps:$4 sm:$0xff]   ;;  %v4298_v4 = vld [vmem:[%s6010_s7 + $0x210] ss:$28 sps:$4 sm:$0xff]   ;;  %v4303_v41 = vld [vmem:[%s6010_s7 + $0x248] ss:$28 sps:$4 sm:$0xff]  }
 0x2c2   :  { %v4299_v39 = vld [vmem:[%s6010_s7 + $0x50] ss:$28 sps:$4 sm:$0xff]   ;;  %v4300_v42 = vld [vmem:[%s6010_s7 + $0x80] ss:$28 sps:$4 sm:$0xff]   ;;  %v4304_v43 = vld [vmem:[%s6010_s7 + $0x88] ss:$28 sps:$4 sm:$0xff]  }
 0x2c3   :  { %v4307_v44 = vld [vmem:[%s6010_s7 + $0xbc] ss:$28 sps:$4 sm:$0xff]  }
 0x2c4   :  { %2515 = vmatpush1.bf16.msra.mxu0 %v4242_v45  ;;  %2661 = vmatpush1.bf16.msra.mxu1 %v4245_v46  ;;  %v4308_v45 = vld [vmem:[%s6010_s7 + $0x280] ss:$28 sps:$4 sm:$0xff]   ;;  %v4305_v46 = vld [vmem:[%s6010_s7 + $0xb8] ss:$28 sps:$4 sm:$0xff]  }
 0x2c5   :  { %2516 = vmatprep.subr.bf16.mxu0 %v4250_v47  ;;  %2662 = vmatprep.subr.bf16.mxu1 %v4253_v51  ;;  %v4309_v47 = vld [vmem:[%s6010_s7 + $0xc0] ss:$28 sps:$4 sm:$0xff]   ;;  %v4312_v51 = vld [vmem:[%s6010_s7 + $0xf4] ss:$28 sps:$4 sm:$0xff]  }
 0x2c8   :  { %2517 = vmatpush1.bf16.msra.mxu0 %v4248_v52  ;;  %2663 = vmatpush1.bf16.msra.mxu1 %v4251_v53  ;;  %v4313_v52 = vld [vmem:[%s6010_s7 + $0x2b8] ss:$28 sps:$4 sm:$0xff]   ;;  %v4310_v53 = vld [vmem:[%s6010_s7 + $0xf0] ss:$28 sps:$4 sm:$0xff]  }
 0x2c9   :  { %2518 = vmatprep.subr.bf16.mxu0 %v4256_v55  ;;  %2664 = vmatprep.subr.bf16.mxu1 %v4259_v58  ;;  %v4314_v55 = vld [vmem:[%s6010_s7 + $0xf8] ss:$28 sps:$4 sm:$0xff]   ;;  %v4317_v58 = vld [vmem:[%s6010_s7 + $0x12c] ss:$28 sps:$4 sm:$0xff]  }
 0x2cc   :  { %2519 = vmatpush1.bf16.msra.mxu0 %v4254_v63  ;;  %2665 = vmatpush1.bf16.msra.mxu1 %v4257_v5  ;;  %v4318_v63 = vld [vmem:[%s6010_s7 + $0x2f0] ss:$28 sps:$4 sm:$0xff]   ;;  %v4315_v5 = vld [vmem:[%s6010_s7 + $0x128] ss:$28 sps:$4 sm:$0xff]  }
 0x2cd   :  { %2520 = vmatprep.subr.bf16.mxu0 %v4262_v6  ;;  %2666 = vmatprep.subr.bf16.mxu1 %v4265_v7  ;;  %v4319_v6 = vld [vmem:[%s6010_s7 + $0x130] ss:$28 sps:$4 sm:$0xff]   ;;  %v4322_v7 = vld [vmem:[%s6010_s7 + $0x164] ss:$28 sps:$4 sm:$0xff]  }
 0x2d0   :  { %2521 = vmatpush1.bf16.msra.mxu0 %v4260_v8  ;;  %2667 = vmatpush1.bf16.msra.mxu1 %v4263_v9  ;;  %v4323_v8 = vld [vmem:[%s6010_s7 + $0x328] ss:$28 sps:$4 sm:$0xff]   ;;  %v4320_v9 = vld [vmem:[%s6010_s7 + $0x160] ss:$28 sps:$4 sm:$0xff]  }
 0x2d1   :  { %2522 = vmatprep.subr.bf16.mxu0 %v4268_v60  ;;  %2668 = vmatprep.subr.bf16.mxu1 %v4271_v61  ;;  %v4324_v60 = vld [vmem:[%s6010_s7 + $0x168] ss:$28 sps:$4 sm:$0xff]   ;;  %v4327_v61 = vld [vmem:[%s6010_s7 + $0x19c] ss:$28 sps:$4 sm:$0xff]  }
 0x2d4   :  { %2523 = vmatpush1.bf16.msra.mxu0 %v4266_v14  ;;  %2669 = vmatpush1.bf16.msra.mxu1 %v4269_v15  ;;  %v4328_v14 = vld [vmem:[%s6010_s7 + $0x360] ss:$28 sps:$4 sm:$0xff]   ;;  %v4325_v15 = vld [vmem:[%s6010_s7 + $0x198] ss:$28 sps:$4 sm:$0xff]  }
 0x2d5   :  { %2524 = vmatprep.subr.bf16.mxu0 %v4274_v16  ;;  %2670 = vmatprep.subr.bf16.mxu1 %v4277_v17  ;;  %v4329_v16 = vld [vmem:[%s6010_s7 + $0x1a0] ss:$28 sps:$4 sm:$0xff]   ;;  %v4332_v17 = vld [vmem:[%s6010_s7 + $0x1d4] ss:$28 sps:$4 sm:$0xff]  }
 0x2d8   :  { %2525 = vmatpush1.bf16.msra.mxu0 %v4272_v18  ;;  %2671 = vmatpush1.bf16.msra.mxu1 %v4275_v19  ;;  %v4330_v18 = vld [vmem:[%s6010_s7 + $0x1d0] ss:$28 sps:$4 sm:$0xff]   ;;  %v4334_v19 = vld [vmem:[%s6010_s7 + $0x398] ss:$28 sps:$4 sm:$0xff]  }
 0x2d9   :  { %2526 = vmatprep.subr.bf16.mxu0 %v4280_v20  ;;  %2672 = vmatprep.subr.bf16.mxu1 %v4283_v21  ;;  %v4337_v20 = vld [vmem:[%s6010_s7 + $0x20c] ss:$28 sps:$4 sm:$0xff]  }
 0x2da   :  { %v4338_v21 = vld [vmem:[%s6010_s7 + $0x590] ss:$28 sps:$4 sm:$0xff]  }
 0x2dc   :  { %2527 = vmatpush1.bf16.msra.mxu0 %v4278_v22  ;;  %2673 = vmatpush1.bf16.msra.mxu1 %v4281_v24  ;;  %v4335_v22 = vld [vmem:[%s6010_s7 + $0x208] ss:$28 sps:$4 sm:$0xff]   ;;  %v4339_v24 = vld [vmem:[%s6010_s7 + $0x3d0] ss:$28 sps:$4 sm:$0xff]  }
 0x2dd   :  { %2528 = vmatprep.subr.bf16.mxu0 %v4286_v1  ;;  %2674 = vmatprep.subr.bf16.mxu1 %v4289_v25  ;;  %v4342_v1 = vld [vmem:[%s6010_s7 + $0x244] ss:$28 sps:$4 sm:$0xff]  }
 0x2de   :  { %v4343_v25 = vld [vmem:[%s6010_s7 + $0x5c8] ss:$28 sps:$4 sm:$0xff]  }
 0x2e0   :  { %2529 = vmatpush1.bf16.msra.mxu0 %v4284_v26  ;;  %2675 = vmatpush1.bf16.msra.mxu1 %v4287_v27  ;;  %v4340_v26 = vld [vmem:[%s6010_s7 + $0x240] ss:$28 sps:$4 sm:$0xff]   ;;  %v4344_v27 = vld [vmem:[%s6010_s7 + $0x408] ss:$28 sps:$4 sm:$0xff]  }
 0x2e1   :  { %2717 = vmatprep.subr.bf16.mxu0 %v4292_v2  ;;  %3779 = vmatprep.subr.bf16.mxu1 %v4293_v3  ;;  %v4347_v2 = vld [vmem:[%s6010_s7 + $0x27c] ss:$28 sps:$4 sm:$0xff]  }
 0x2e2   :  { %v4348_v3 = vld [vmem:[%s6010_s7 + $0x600] ss:$28 sps:$4 sm:$0xff]  }
 0x2e3   :  { %2531 = vmatmul.mubr.bf16.vlgmr.msra.gmra.mrb[16].mxu0 %v5249_v29  ;;  %2677 = vmatmul.mubr.bf16.vlgmr.msra.gmra.mrb[40].mxu1 %v5249_v29 }
 0x2e4   :  { %2540 = vmatprep.mubr.bf16.mxu0 %v5297_v13  ;;  %2686 = vmatprep.mubr.bf16.mxu1 %v5297_v13 }
 0x2e5   :  { %2718 = vmatpush1.bf16.msra.mxu0 %v4290_v31  ;;  %3780 = vmatpush3.bf16.msra.mxu1 %v4294_v32  ;;  %v4345_v31 = vld [vmem:[%s6010_s7 + $0x278] ss:$28 sps:$4 sm:$0xff]   ;;  %v4349_v32 = vld [vmem:[%s6010_s7 + $0x440] ss:$28 sps:$4 sm:$0xff]  }
 0x2e6   :  { %2719 = vmatprep.subr.bf16.mxu0 %v4297_v33  ;;  %3781 = vmatprep.subr.bf16.mxu1 %v4298_v4  ;;  %v4352_v33 = vld [vmem:[%s6010_s7 + $0x2b4] ss:$28 sps:$4 sm:$0xff]  }
 0x2e7   :  { %v4353_v4 = vld [vmem:[%s6010_s7 + $0x638] ss:$28 sps:$4 sm:$0xff]  }
 0x2e9   :  { %2720 = vmatpush1.bf16.msra.mxu0 %v4295_v37  ;;  %3782 = vmatpush3.bf16.msra.mxu1 %v4299_v39  ;;  %v4350_v37 = vld [vmem:[%s6010_s7 + $0x2b0] ss:$28 sps:$4 sm:$0xff]   ;;  %v4354_v39 = vld [vmem:[%s6010_s7 + $0x478] ss:$28 sps:$4 sm:$0xff]  }
 0x2ea   :  { %2721 = vmatprep.subr.bf16.mxu0 %v4302_v40  ;;  %3783 = vmatprep.subr.bf16.mxu1 %v4303_v41  ;;  %v4357_v40 = vld [vmem:[%s6010_s7 + $0x2ec] ss:$28 sps:$4 sm:$0xff]  }
 0x2eb   :  { %2541 = vmatmul.mubr.bf16.gmra.mrb[20].mxu0 %v5293_v11  ;;  %2687 = vmatmul.mubr.bf16.gmra.mrb[44].mxu1 %v5293_v11  ;;  %v4358_v41 = vld [vmem:[%s6010_s7 + $0x670] ss:$28 sps:$4 sm:$0xff]  }
 0x2ec   :  { %2550 = vmatprep.mubr.bf16.mxu0 %v5347_v54  ;;  %2696 = vmatprep.mubr.bf16.mxu1 %v5347_v54 }
 0x2ed   :  { %2722 = vmatpush1.bf16.msra.mxu0 %v4300_v42  ;;  %3784 = vmatpush3.bf16.msra.mxu1 %v4304_v43  ;;  %v4355_v42 = vld [vmem:[%s6010_s7 + $0x2e8] ss:$28 sps:$4 sm:$0xff]   ;;  %v4359_v43 = vld [vmem:[%s6010_s7 + $0x4b0] ss:$28 sps:$4 sm:$0xff]  }
 0x2ee   :  { %2723 = vmatprep.subr.bf16.mxu0 %v4307_v44  ;;  %3785 = vmatprep.subr.bf16.mxu1 %v4308_v45  ;;  %v4362_v44 = vld [vmem:[%s6010_s7 + $0x324] ss:$28 sps:$4 sm:$0xff]  }
 0x2ef   :  { %v4363_v45 = vld [vmem:[%s6010_s7 + $0x6a8] ss:$28 sps:$4 sm:$0xff]  }
 0x2f1   :  { %2724 = vmatpush1.bf16.msra.mxu0 %v4305_v46  ;;  %3786 = vmatpush3.bf16.msra.mxu1 %v4309_v47  ;;  %v4360_v46 = vld [vmem:[%s6010_s7 + $0x320] ss:$28 sps:$4 sm:$0xff]   ;;  %v4364_v47 = vld [vmem:[%s6010_s7 + $0x4e8] ss:$28 sps:$4 sm:$0xff]  }
 0x2f2   :  { %2725 = vmatprep.subr.bf16.mxu0 %v4312_v51  ;;  %3787 = vmatprep.subr.bf16.mxu1 %v4313_v52  ;;  %v4367_v51 = vld [vmem:[%s6010_s7 + $0x35c] ss:$28 sps:$4 sm:$0xff]  }
 0x2f3   :  { %2551 = vmatmul.mubr.bf16.gmra.mrb[24].mxu0 %v5337_v49  ;;  %2697 = vmatmul.mubr.bf16.gmra.mrb[48].mxu1 %v5337_v49  ;;  %v4368_v52 = vld [vmem:[%s6010_s7 + $0x6e0] ss:$28 sps:$4 sm:$0xff]  }
 0x2f4   :  { %2560 = vmatprep.mubr.bf16.mxu0 %v5391_v38  ;;  %2706 = vmatprep.mubr.bf16.mxu1 %v5391_v38 }
 0x2f5   :  { %2726 = vmatpush1.bf16.msra.mxu0 %v4310_v53  ;;  %3788 = vmatpush3.bf16.msra.mxu1 %v4314_v55  ;;  %v4365_v53 = vld [vmem:[%s6010_s7 + $0x358] ss:$28 sps:$4 sm:$0xff]   ;;  %v4369_v55 = vld [vmem:[%s6010_s7 + $0x520] ss:$28 sps:$4 sm:$0xff]  }
 0x2f6   :  { %2727 = vmatprep.subr.bf16.mxu0 %v4317_v58  ;;  %3789 = vmatprep.subr.bf16.mxu1 %v4318_v63  ;;  %v4372_v58 = vld [vmem:[%s6010_s7 + $0x394] ss:$28 sps:$4 sm:$0xff]  }
 0x2f7   :  { %v4370_v63 = vld [vmem:[%s6010_s7 + $0x390] ss:$28 sps:$4 sm:$0xff]  }
 0x2f9   :  { %2728 = vmatpush1.bf16.msra.mxu0 %v4315_v5  ;;  %3790 = vmatpush3.bf16.msra.mxu1 %v4319_v6  ;;  %v4375_v5 = vld [vmem:[%s6010_s7 + $0x3cc] ss:$28 sps:$4 sm:$0xff]  }
 0x2fa   :  { %2729 = vmatprep.subr.bf16.mxu0 %v4322_v7  ;;  %3791 = vmatprep.subr.bf16.mxu1 %v4323_v8  ;;  %v4373_v6 = vld [vmem:[%s6010_s7 + $0x3c8] ss:$28 sps:$4 sm:$0xff]   ;;  %v4379_v8 = vld [vmem:[%s6010_s7 + $0x438] ss:$28 sps:$4 sm:$0xff]  }
 0x2fb   :  { %2561 = vmatmul.mubr.bf16.gmra.mrb[28].mxu0 %v5381_v35  ;;  %2707 = vmatmul.mubr.bf16.gmra.mrb[52].mxu1 %v5381_v35  ;;  %v4378_v7 = vld [vmem:[%s6010_s7 + $0x404] ss:$28 sps:$4 sm:$0xff]  }
 0x2fc   :  { %2749 = vmatprep.mubr.bf16.mxu0 %v5251_v30  ;;  %2895 = vmatprep.mubr.bf16.mxu1 %v5251_v30  ;;  %v4333_v30 = vld [vmem:[%s6010_s7 + $0x558] ss:$28 sps:$4 sm:$0xff]  }
 0x2fd   :  { %2730 = vmatpush1.bf16.msra.mxu0 %v4320_v9  ;;  %3792 = vmatpush3.bf16.msra.mxu1 %v4324_v60  ;;  %v4384_v9 = vld [vmem:[%s6010_s7 + $0x474] ss:$28 sps:$4 sm:$0xff]   ;;  %v4385_v60 = vld [vmem:[%s6010_s7 + $0x4a8] ss:$28 sps:$4 sm:$0xff]  }
 0x2fe   :  { %2731 = vmatprep.subr.bf16.mxu0 %v4327_v61  ;;  %3793 = vmatprep.subr.bf16.mxu1 %v4328_v14  ;;  %v4390_v61 = vld [vmem:[%s6010_s7 + $0x4e4] ss:$28 sps:$4 sm:$0xff]   ;;  %v4391_v14 = vld [vmem:[%s6010_s7 + $0x518] ss:$28 sps:$4 sm:$0xff]  }
 0x301   :  { %2732 = vmatpush1.bf16.msra.mxu0 %v4325_v15  ;;  %3794 = vmatpush3.bf16.msra.mxu1 %v4329_v16  ;;  %v4396_v15 = vld [vmem:[%s6010_s7 + $0x554] ss:$28 sps:$4 sm:$0xff]  }
 0x302   :  { %2733 = vmatprep.subr.bf16.mxu0 %v4332_v17  ;;  %3819 = vmatprep.subr.bf16.mxu1 %v4333_v30  ;;  %v4394_v16 = vld [vmem:[%s6010_s7 + $0x550] ss:$28 sps:$4 sm:$0xff]   ;;  %v4402_v17 = vld [vmem:[%s6010_s7 + $0x5c4] ss:$28 sps:$4 sm:$0xff]  }
 0x303   :  { %v4400_v30 = vld [vmem:[%s6010_s7 + $0x5c0] ss:$28 sps:$4 sm:$0xff]  }
 0x304   :  { %2896 = vmatmul.mubr.bf16.vlgmr.msra.gmra.mrb[56].mxu1 %v5247_v28 }
 0x305   :  { %2734 = vmatpush1.bf16.msra.mxu0 %v4330_v18  ;;  %2903 = vmatprep.mubr.bf16.mxu1 %v5295_v12  ;;  %v4405_v18 = vld [vmem:[%s6010_s7 + $0x5fc] ss:$28 sps:$4 sm:$0xff]  }
 0x306   :  { %3820 = vmatpush3.bf16.msra.mxu1 %v4334_v19  ;;  %2735 = vmatprep.subr.bf16.mxu0 %v4337_v20  ;;  %v4403_v19 = vld [vmem:[%s6010_s7 + $0x5f8] ss:$28 sps:$4 sm:$0xff]  }
 0x307   :  { %3821 = vmatprep.subr.bf16.mxu1 %v4338_v21  ;;  %v4408_v20 = vld [vmem:[%s6010_s7 + $0x634] ss:$28 sps:$4 sm:$0xff]  }
 0x308   :  { %v4406_v21 = vld [vmem:[%s6010_s7 + $0x630] ss:$28 sps:$4 sm:$0xff]  }
 0x309   :  { %2736 = vmatpush1.bf16.msra.mxu0 %v4335_v22  ;;  %v4411_v22 = vld [vmem:[%s6010_s7 + $0x66c] ss:$28 sps:$4 sm:$0xff]  }
 0x30a   :  { %3822 = vmatpush3.bf16.msra.mxu1 %v4339_v24  ;;  %2737 = vmatprep.subr.bf16.mxu0 %v4342_v1  ;;  %v4409_v24 = vld [vmem:[%s6010_s7 + $0x668] ss:$28 sps:$4 sm:$0xff]  }
 0x30b   :  { %3823 = vmatprep.subr.bf16.mxu1 %v4343_v25  ;;  %v4414_v1 = vld [vmem:[%s6010_s7 + $0x6a4] ss:$28 sps:$4 sm:$0xff]  }
 0x30c   :  { %2904 = vmatmul.mubr.bf16.gmra.mrb[60].mxu1 %v5291_v10  ;;  %v4412_v25 = vld [vmem:[%s6010_s7 + $0x6a0] ss:$28 sps:$4 sm:$0xff]  }
 0x30d   :  { %2738 = vmatpush1.bf16.msra.mxu0 %v4340_v26  ;;  %2911 = vmatprep.mubr.bf16.mxu1 %v5339_v50  ;;  %v4417_v26 = vld [vmem:[%s6010_s7 + $0x6dc] ss:$28 sps:$4 sm:$0xff]  }
 0x30e   :  { %3824 = vmatpush3.bf16.msra.mxu1 %v4344_v27  ;;  %2739 = vmatprep.subr.bf16.mxu0 %v4347_v2  ;;  %v4415_v27 = vld [vmem:[%s6010_s7 + $0x6d8] ss:$28 sps:$4 sm:$0xff]   ;;  %v5844_v2 = vld [vmem:[%s6011_s8] sm:$0x7f] }
 0x30f   :  { %3825 = vmatprep.subr.bf16.mxu1 %v4348_v3 }
 0x311   :  { %2740 = vmatpush1.bf16.msra.mxu0 %v4345_v31 }
 0x312   :  { %3826 = vmatpush3.bf16.msra.mxu1 %v4349_v32  ;;  %2741 = vmatprep.subr.bf16.mxu0 %v4352_v33 }
 0x313   :  { %3827 = vmatprep.subr.bf16.mxu1 %v4353_v4 }
 0x314   :  { %2912 = vmatmul.mubr.bf16.gmra.mrb[64].mxu1 %v5335_v48 }
 0x315   :  { %2742 = vmatpush1.bf16.msra.mxu0 %v4350_v37  ;;  %2919 = vmatprep.mubr.bf16.mxu1 %v5383_v36 }
 0x316   :  { %3828 = vmatpush3.bf16.msra.mxu1 %v4354_v39  ;;  %2743 = vmatprep.subr.bf16.mxu0 %v4357_v40 }
 0x317   :  { %3829 = vmatprep.subr.bf16.mxu1 %v4358_v41 }
 0x319   :  { %2744 = vmatpush1.bf16.msra.mxu0 %v4355_v42 }
 0x31a   :  { %3830 = vmatpush3.bf16.msra.mxu1 %v4359_v43  ;;  %2745 = vmatprep.subr.bf16.mxu0 %v4362_v44 }
 0x31b   :  { %3831 = vmatprep.subr.bf16.mxu1 %v4363_v45 }
 0x31c   :  { %2920 = vmatmul.mubr.bf16.gmra.mrb[68].mxu1 %v5379_v34 }
 0x31d   :  { %2746 = vmatpush1.bf16.msra.mxu0 %v4360_v46  ;;  %2960 = vmatprep.mubr.bf16.mxu1 %v5253_v23 }
 0x31e   :  { %3832 = vmatpush3.bf16.msra.mxu1 %v4364_v47  ;;  %2747 = vmatprep.subr.bf16.mxu0 %v4367_v51 }
 0x31f   :  { %3833 = vmatprep.subr.bf16.mxu1 %v4368_v52 }
 0x321   :  { %2748 = vmatpush1.bf16.msra.mxu0 %v4365_v53 }
 0x322   :  { %3834 = vmatpush3.bf16.msra.mxu1 %v4369_v55  ;;  %2790 = vmatprep.subr.bf16.mxu0 %v4372_v58 }
 0x324   :  { %2750 = vmatmul.mubr.bf16.vlgmr.msra.gmra.mrb[32].mxu0 %v5247_v28  ;;  %v4376_v28 = vld [vmem:[%s6010_s7 + $0x400] ss:$28 sps:$4 sm:$0xff]  }
 0x325   :  { %2961 = vmatmul.mubr.bf16.vlgmr.msra.gmra.mrb[72].mxu1 %v5249_v29  ;;  %2759 = vmatprep.mubr.bf16.mxu0 %v5295_v12  ;;  %v4381_v12 = vld [vmem:[%s6010_s7 + $0x43c] ss:$28 sps:$4 sm:$0xff]  }
 0x326   :  { %2791 = vmatpush1.bf16.msra.mxu0 %v4370_v63  ;;  %2968 = vmatprep.mubr.bf16.mxu1 %v5297_v13 }
 0x327   :  { %2792 = vmatprep.subr.bf16.mxu0 %v4375_v5 }
 0x32a   :  { %2793 = vmatpush1.bf16.msra.mxu0 %v4373_v6 }
 0x32b   :  { %2794 = vmatprep.subr.bf16.mxu0 %v4378_v7 }
 0x32c   :  { %2760 = vmatmul.mubr.bf16.gmra.mrb[36].mxu0 %v5291_v10  ;;  %v4382_v10 = vld [vmem:[%s6010_s7 + $0x470] ss:$28 sps:$4 sm:$0xff]  }
 0x32d   :  { %2969 = vmatmul.mubr.bf16.gmra.mrb[76].mxu1 %v5293_v11  ;;  %2769 = vmatprep.mubr.bf16.mxu0 %v5339_v50  ;;  %v4387_v50 = vld [vmem:[%s6010_s7 + $0x4ac] ss:$28 sps:$4 sm:$0xff]  }
 0x32e   :  { %2795 = vmatpush1.bf16.msra.mxu0 %v4376_v28  ;;  %2976 = vmatprep.mubr.bf16.mxu1 %v5347_v54 }
 0x32f   :  { %2796 = vmatprep.subr.bf16.mxu0 %v4381_v12 }
 0x332   :  { %2797 = vmatpush1.bf16.msra.mxu0 %v4379_v8 }
 0x333   :  { %2798 = vmatprep.subr.bf16.mxu0 %v4384_v9 }
 0x334   :  { %2770 = vmatmul.mubr.bf16.gmra.mrb[40].mxu0 %v5335_v48  ;;  %v4388_v48 = vld [vmem:[%s6010_s7 + $0x4e0] ss:$28 sps:$4 sm:$0xff]  }
 0x335   :  { %2977 = vmatmul.mubr.bf16.gmra.mrb[80].mxu1 %v5337_v49  ;;  %2779 = vmatprep.mubr.bf16.mxu0 %v5383_v36  ;;  %v4393_v36 = vld [vmem:[%s6010_s7 + $0x51c] ss:$28 sps:$4 sm:$0xff]  }
 0x336   :  { %2799 = vmatpush1.bf16.msra.mxu0 %v4382_v10  ;;  %2984 = vmatprep.mubr.bf16.mxu1 %v5391_v38 }
 0x337   :  { %2800 = vmatprep.subr.bf16.mxu0 %v4387_v50 }
 0x33a   :  { %2801 = vmatpush1.bf16.msra.mxu0 %v4385_v60 }
 0x33b   :  { %2802 = vmatprep.subr.bf16.mxu0 %v4390_v61 }
 0x33c   :  { %2780 = vmatmul.mubr.bf16.gmra.mrb[44].mxu0 %v5379_v34  ;;  %v4397_v34 = vld [vmem:[%s6010_s7 + $0x588] ss:$28 sps:$4 sm:$0xff]  }
 0x33d   :  { %2985 = vmatmul.mubr.bf16.gmra.mrb[84].mxu1 %v5381_v35  ;;  %2822 = vmatprep.mubr.bf16.mxu0 %v5253_v23  ;;  %v4399_v23 = vld [vmem:[%s6010_s7 + $0x58c] ss:$28 sps:$4 sm:$0xff]   ;;  %s4667_s7 = smov [#allocation2]  }
 0x33e   :  { %2803 = vmatpush1.bf16.msra.mxu0 %v4388_v48  ;;  %s3391_s8 = sshll.u32 %s4667_s7, 4  ;;  %s3392_s8 = int_to_ptr.vmem [resolvable:$true] %s3391_s8 }
 0x33f   :  { %2804 = vmatprep.subr.bf16.mxu0 %v4393_v36  ;;  %s4642_s19 = scalar_lea.vmem %s3392_s8, 7168  ;;  %p4647_p1 = scmp.lt.s32.totalorder %s3392_s8, %s3392_s8 }
 0x340   :  { %p4643_p0 = scmp.ne.s32.totalorder %s3392_s8, %s4642_s19  ;;  %p4648_p2 = scmp.lt.s32.totalorder %s4642_s19, %s4642_s19 }
 0x342   :  { %2805 = vmatpush1.bf16.msra.mxu0 %v4391_v14  ;;  %p4649_p3 = por %p4648_p2, %p4647_p1 }
 0x343   :  { %2806 = vmatprep.subr.bf16.mxu0 %v4396_v15 }
 0x344   :  { %p4650_p4 = pnand %p4649_p3, %p4643_p0 }
 0x346   :  { %2807 = vmatpush1.bf16.msra.mxu0 %v4394_v16 }
 0x347   :  { %2808 = vmatprep.subr.bf16.mxu0 %v4399_v23 }
 0x34a   :  { %2809 = vmatpush1.bf16.msra.mxu0 %v4397_v34 }
 0x34b   :  { %2810 = vmatprep.subr.bf16.mxu0 %v4402_v17 }
 0x34e   :  { %2811 = vmatpush1.bf16.msra.mxu0 %v4400_v30 }
 0x34f   :  { %2812 = vmatprep.subr.bf16.mxu0 %v4405_v18 }
 0x352   :  { %2813 = vmatpush1.bf16.msra.mxu0 %v4403_v19 }
 0x353   :  { %2814 = vmatprep.subr.bf16.mxu0 %v4408_v20 }
 0x356   :  { %2815 = vmatpush1.bf16.msra.mxu0 %v4406_v21 }
 0x357   :  { %2816 = vmatprep.subr.bf16.mxu0 %v4411_v22 }
 0x35a   :  { %2817 = vmatpush1.bf16.msra.mxu0 %v4409_v24 }
 0x35b   :  { %2818 = vmatprep.subr.bf16.mxu0 %v4414_v1 }
 0x35e   :  { %2819 = vmatpush1.bf16.msra.mxu0 %v4412_v25 }
 0x35f   :  { %2820 = vmatprep.subr.bf16.mxu0 %v4417_v26 }
 0x362   :  { %2821 = vmatpush1.bf16.msra.mxu0 %v4415_v27 }
 0x365   :  { %2823 = vmatmul.mubr.bf16.vlgmr.msra.gmra.mrb[32].mxu0 %v5249_v29  ;;  %v5848_v29 = vrot.slane %v5844_v2, %v4998_v57 }
 0x366   :  { %2832 = vmatprep.mubr.bf16.mxu0 %v5297_v13  ;;  %v5857_v13 = vrot.slane %v5844_v2, %v5004_v59 }
 0x36d   :  { %2833 = vmatmul.mubr.bf16.gmra.mrb[36].mxu0 %v5293_v11  ;;  %v5853_v11 = vrot.slane %v5844_v2, %v456_v62 }
 0x36e   :  { %2842 = vmatprep.mubr.bf16.mxu0 %v5347_v54 }
 0x375   :  { %2843 = vmatmul.mubr.bf16.gmra.mrb[40].mxu0 %v5337_v49  ;;  %v5862_v49 = vrot.slane %v5844_v2, %v460_v0 }
 0x376   :  { %2852 = vmatprep.mubr.bf16.mxu0 %v5391_v38 }
 0x37d   :  { %2853 = vmatmul.mubr.bf16.gmra.mrb[44].mxu0 %v5381_v35 }
 0x3b6   :  { %v2532_v54 = vpop.f32.mrb[16].mxu0  ;;  %v2678_v35 = vpop.f32.mrb[40].mxu1 }
 0x3b7   :  { %v3871_v38 = vadd.f32 %v2532_v54, %v5848_v29  ;;  %v3887_v57 = vadd.f32 %v2678_v35, %v5853_v11  ;;  %v2534_v3 = vpop.f32.mrb[17].mxu0  ;;  %v2680_v31 = vpop.f32.mrb[41].mxu1 }
 0x3b8   :  { %v3872_v62 = vadd.f32 %v2534_v3, %v5857_v13  ;;  %v3888_v32 = vadd.f32 %v2680_v31, %v5862_v49  ;;  %v2536_v33 = vpop.f32.mrb[18].mxu0  ;;  %v2682_v59 = vpop.f32.mrb[42].mxu1 }
 0x3b9   :  { %v3717_v4 = vmul.f32 -1.442695, %v3871_v38  ;;  %v3719_v37 = vmul.f32 -1.442695, %v3887_v57  ;;  %v3873_v39 = vadd.f32 %v2536_v33, %v5848_v29  ;;  %v3889_v0 = vadd.f32 %v2682_v59, %v5853_v11  ;;  %v2538_v40 = vpop.f32.mrb[19].mxu0  ;;  %v2684_v41 = vpop.f32.mrb[43].mxu1 }
 0x3ba   :  { %v3718_v42 = vmul.f32 -1.442695, %v3872_v62  ;;  %v3720_v43 = vmul.f32 -1.442695, %v3888_v32  ;;  %v3874_v44 = vadd.f32 %v2538_v40, %v5857_v13  ;;  %v3890_v45 = vadd.f32 %v2684_v41, %v5862_v49 }
 0x3bb   :  { %4418 = vpow2.f32 %v3717_v4  ;;  %v3724_v46 = vmul.f32 -1.442695, %v3873_v39  ;;  %v3726_v47 = vmul.f32 -1.442695, %v3889_v0 }
 0x3bc   :  { %4420 = vpow2.f32 %v3719_v37  ;;  %v3725_v51 = vmul.f32 -1.442695, %v3874_v44  ;;  %v3727_v52 = vmul.f32 -1.442695, %v3890_v45 }
 0x3bd   :  { %4422 = vpow2.f32 %v3718_v42 }
 0x3be   :  { %4424 = vpow2.f32 %v3720_v43  ;;  %v2542_v53 = vpop.f32.mrb[20].mxu0  ;;  %v2688_v55 = vpop.f32.mrb[44].mxu1 }
 0x3bf   :  { %4426 = vpow2.f32 %v3724_v46  ;;  %v3875_v58 = vadd.f32 %v2542_v53, %v5848_v29  ;;  %v3891_v63 = vadd.f32 %v2688_v55, %v5853_v11  ;;  %v2544_v5 = vpop.f32.mrb[21].mxu0  ;;  %v2690_v6 = vpop.f32.mrb[45].mxu1 }
 0x3c0   :  { %4428 = vpow2.f32 %v3726_v47  ;;  %v3876_v7 = vadd.f32 %v2544_v5, %v5857_v13  ;;  %v3892_v28 = vadd.f32 %v2690_v6, %v5862_v49  ;;  %v2546_v12 = vpop.f32.mrb[22].mxu0  ;;  %v2692_v8 = vpop.f32.mrb[46].mxu1 }
 0x3c1   :  { %4430 = vpow2.f32 %v3725_v51  ;;  %v3731_v9 = vmul.f32 -1.442695, %v3875_v58  ;;  %v3733_v10 = vmul.f32 -1.442695, %v3891_v63  ;;  %v3877_v50 = vadd.f32 %v2546_v12, %v5848_v29  ;;  %v2548_v60 = vpop.f32.mrb[23].mxu0  ;;  %v2694_v61 = vpop.f32.mrb[47].mxu1 }
 0x3c2   :  { %4432 = vpow2.f32 %v3727_v52  ;;  %v3732_v48 = vmul.f32 -1.442695, %v3876_v7  ;;  %v3734_v36 = vmul.f32 -1.442695, %v3892_v28  ;;  %v3893_v59 = vadd.f32 %v2692_v8, %v5853_v11 }
 0x3c3   :  { %4434 = vpow2.f32 %v3731_v9  ;;  %v3738_v14 = vmul.f32 -1.442695, %v3877_v50  ;;  %v3878_v39 = vadd.f32 %v2548_v60, %v5857_v13  ;;  %v3894_v42 = vadd.f32 %v2694_v61, %v5862_v49 }
 0x3c4   :  { %4436 = vpow2.f32 %v3733_v10  ;;  %v3740_v58 = vmul.f32 -1.442695, %v3893_v59 }
 0x3c5   :  { %v4419_v15 = vpop.eup %4418  ;;  %4438 = vpow2.f32 %v3732_v48  ;;  %v3739_v12 = vmul.f32 -1.442695, %v3878_v39  ;;  %v3741_v50 = vmul.f32 -1.442695, %v3894_v42 }
 0x3c6   :  { %v4421_v16 = vpop.eup %4420  ;;  %v3161_v23 = vadd.f32 1.0, %v4419_v15  ;;  %4440 = vpow2.f32 %v3734_v36  ;;  %v2552_v34 = vpop.f32.mrb[24].mxu0 }
 0x3c7   :  { %v2698_v17 = vpop.f32.mrb[48].mxu1  ;;  %v4423_v30 = vpop.eup %4422  ;;  %v3163_v18 = vadd.f32 1.0, %v4421_v16  ;;  %4442 = vpow2.f32 %v3738_v14  ;;  %v3879_v47 = vadd.f32 %v2552_v34, %v5848_v29 }
 0x3c8   :  { %v2554_v19 = vpop.f32.mrb[25].mxu0  ;;  %v2700_v20 = vpop.f32.mrb[49].mxu1  ;;  %4444 = vrcp.f32 %v3161_v23  ;;  %v3162_v22 = vadd.f32 1.0, %v4423_v30  ;;  %v3895_v63 = vadd.f32 %v2698_v17, %v5853_v11 }
 0x3c9   :  { %v4425_v21 = vpop.eup %4424  ;;  %v2556_v24 = vpop.f32.mrb[26].mxu0  ;;  %4446 = vrcp.f32 %v3163_v18  ;;  %v3880_v8 = vadd.f32 %v2554_v19, %v5857_v13  ;;  %v3896_v60 = vadd.f32 %v2700_v20, %v5862_v49  ;;  %v3745_v48 = vmul.f32 -1.442695, %v3879_v47 }
 0x3ca   :  { %v5877_v1 = vpop.f32.mrb[50].mxu1  ;;  %v4427_v25 = vpop.eup %4426  ;;  %v3164_v26 = vadd.f32 1.0, %v4425_v21  ;;  %4448 = vrcp.f32 %v3162_v22  ;;  %v3881_v36 = vadd.f32 %v2556_v24, %v5848_v29  ;;  %v3747_v15 = vmul.f32 -1.442695, %v3895_v63 }
 0x3cb   :  { %v5879_v27 = vpop.f32.mrb[27].mxu0  ;;  %v4429_v54 = vpop.eup %4428  ;;  %v3168_v35 = vadd.f32 1.0, %v4427_v25  ;;  %v3897_v16 = vadd.f32 %v5877_v1, %v5853_v11  ;;  %v3746_v34 = vmul.f32 -1.442695, %v3880_v8  ;;  %v3748_v18 = vmul.f32 -1.442695, %v3896_v60 }
 0x3cc   :  { %v5881_v38 = vpop.f32.mrb[51].mxu1  ;;  %v4431_v57 = vpop.eup %4430  ;;  %4450 = vrcp.f32 %v3164_v26  ;;  %v3170_v3 = vadd.f32 1.0, %v4429_v54  ;;  %v3882_v17 = vadd.f32 %v5879_v27, %v5857_v13  ;;  %v3752_v22 = vmul.f32 -1.442695, %v3881_v36 }
 0x3cd   :  { %v4433_v31 = vpop.eup %4432  ;;  %4452 = vrcp.f32 %v3168_v35  ;;  %v3169_v62 = vadd.f32 1.0, %v4431_v57  ;;  %v3898_v19 = vadd.f32 %v5881_v38, %v5862_v49  ;;  %v3754_v26 = vmul.f32 -1.442695, %v3897_v16 }
 0x3ce   :  { %v4435_v32 = vpop.eup %4434  ;;  %4454 = vrcp.f32 %v3170_v3  ;;  %v3171_v33 = vadd.f32 1.0, %v4433_v31  ;;  %v2562_v0 = vpop.f32.mrb[28].mxu0  ;;  %v3753_v38 = vmul.f32 -1.442695, %v3882_v17 }
 0x3cf   :  { %v4437_v4 = vpop.eup %4436  ;;  %4456 = vrcp.f32 %v3169_v62  ;;  %v3175_v37 = vadd.f32 1.0, %v4435_v32  ;;  %v2708_v43 = vpop.f32.mrb[52].mxu1  ;;  %v3883_v24 = vadd.f32 %v2562_v0, %v5848_v29  ;;  %v3755_v62 = vmul.f32 -1.442695, %v3898_v19 }
 0x3d0   :  { %v4439_v40 = vpop.eup %4438  ;;  %4458 = vrcp.f32 %v3171_v33  ;;  %v3177_v41 = vadd.f32 1.0, %v4437_v4  ;;  %v5886_v44 = vpop.f32.mrb[29].mxu0  ;;  %v3899_v27 = vadd.f32 %v2708_v43, %v5853_v11 }
 0x3d1   :  { %v4441_v45 = vpop.eup %4440  ;;  %4460 = vrcp.f32 %v3175_v37  ;;  %v3176_v46 = vadd.f32 1.0, %v4439_v40  ;;  %v5889_v51 = vpop.f32.mrb[53].mxu1  ;;  %v3759_v59 = vmul.f32 -1.442695, %v3883_v24  ;;  %v3884_v36 = vadd.f32 %v5886_v44, %v5857_v13 }
 0x3d2   :  { %v5891_v52 = vpop.f32.mrb[30].mxu0  ;;  %v4443_v53 = vpop.eup %4442  ;;  %4462 = vrcp.f32 %v3177_v41  ;;  %v3178_v55 = vadd.f32 1.0, %v4441_v45  ;;  %v3761_v37 = vmul.f32 -1.442695, %v3899_v27  ;;  %v3900_v17 = vadd.f32 %v5889_v51, %v5862_v49 }
 0x3d3   :  { %v5894_v5 = vpop.f32.mrb[54].mxu1  ;;  %v5896_v6 = vpop.f32.mrb[31].mxu0  ;;  %4464 = vrcp.f32 %v3176_v46  ;;  %v3182_v28 = vadd.f32 1.0, %v4443_v53 }
 0x3d4   :  { %v4445_v7 = vpop.eup %4444  ;;  %v5899_v9 = vpop.f32.mrb[55].mxu1  ;;  %4466 = vrcp.f32 %v3178_v55 }
 0x3d5   :  { %v4447_v10 = vpop.eup %4446  ;;  %3329 = vst [vmem:[#allocation2] sm:$0xff] %v4445_v7  ;;  %4468 = vrcp.f32 %v3182_v28 }
 0x3d6   :  { %v4449_v61 = vpop.eup %4448  ;;  %3331 = vst [vmem:[#allocation2 + $0x10] sm:$0xff] %v4447_v10  ;;  %4470 = vpow2.f32 %v3740_v58 }
 0x3d7   :  { %v4451_v14 = vpop.eup %4450  ;;  %3330 = vst [vmem:[#allocation2 + $0x8] sm:$0xff] %v4449_v61  ;;  %4472 = vpow2.f32 %v3739_v12  ;;  %v3795_v20 = vpop.f32.mrb[56].mxu1 }
 0x3d8   :  { %v4453_v23 = vpop.eup %4452  ;;  %3332 = vst [vmem:[#allocation2 + $0x18] sm:$0xff] %v4451_v14  ;;  %4474 = vpow2.f32 %v3741_v50  ;;  %v3796_v1 = vpop.f32.mrb[57].mxu1 }
 0x3d9   :  { %v4455_v30 = vpop.eup %4454  ;;  %3337 = vst [vmem:[#allocation2 + $0x38] sm:$0xff] %v4453_v23  ;;  %4476 = vpow2.f32 %v3745_v48  ;;  %v5911_v54 = vadd.f32 %v3796_v1, %v3795_v20  ;;  %v3798_v35 = vpop.f32.mrb[58].mxu1  ;;  %v3885_v20 = vadd.f32 %v5891_v52, %v5848_v29  ;;  %v3760_v1 = vmul.f32 -1.442695, %v3884_v36 }
 0x3da   :  { %v4457_v21 = vpop.eup %4456  ;;  %3339 = vst [vmem:[#allocation2 + $0x48] sm:$0xff] %v4455_v30  ;;  %4478 = vpow2.f32 %v3747_v15  ;;  %v3799_v3 = vpop.f32.mrb[59].mxu1 }
 0x3db   :  { %v4459_v25 = vpop.eup %4458  ;;  %3338 = vst [vmem:[#allocation2 + $0x40] sm:$0xff] %v4457_v21  ;;  %4480 = vpow2.f32 %v3746_v34  ;;  %v5913_v32 = vadd.f32 %v3799_v3, %v3798_v35  ;;  %v3886_v35 = vadd.f32 %v5896_v6, %v5857_v13  ;;  %v3902_v3 = vadd.f32 %v5899_v9, %v5862_v49 }
 0x3dc   :  { %v4461_v57 = vpop.eup %4460  ;;  %3340 = vst [vmem:[#allocation2 + $0x50] sm:$0xff] %v4459_v25  ;;  %4482 = vpow2.f32 %v3748_v18  ;;  %v3901_v25 = vadd.f32 %v5894_v5, %v5853_v11  ;;  %v3766_v11 = vmul.f32 -1.442695, %v3885_v20 }
 0x3dd   :  { %v4463_v31 = vpop.eup %4462  ;;  %3344 = vst [vmem:[#allocation2 + $0x70] sm:$0xff] %v4461_v57  ;;  %4484 = vpow2.f32 %v3752_v22  ;;  %v3767_v13 = vmul.f32 -1.442695, %v3886_v35 }
 0x3de   :  { %v4465_v33 = vpop.eup %4464  ;;  %3346 = vst [vmem:[#allocation2 + $0x80] sm:$0xff] %v4463_v31  ;;  %4486 = vpow2.f32 %v3754_v26 }
 0x3df   :  { %v4467_v4 = vpop.eup %4466  ;;  %3345 = vst [vmem:[#allocation2 + $0x78] sm:$0xff] %v4465_v33  ;;  %4488 = vpow2.f32 %v3753_v38  ;;  %v3801_v40 = vpop.f32.mrb[60].mxu1  ;;  %v3762_v38 = vmul.f32 -1.442695, %v3900_v17 }
 0x3e0   :  { %v4469_v39 = vpop.eup %4468  ;;  %3347 = vst [vmem:[#allocation2 + $0x88] sm:$0xff] %v4467_v4  ;;  %4490 = vpow2.f32 %v3755_v62  ;;  %v3802_v43 = vpop.f32.mrb[61].mxu1  ;;  %v3768_v62 = vmul.f32 -1.442695, %v3901_v25  ;;  %v3769_v4 = vmul.f32 -1.442695, %v3902_v3 }
 0x3e1   :  { %v4471_v0 = vpop.eup %4470  ;;  %3351 = vst [vmem:[#allocation2 + $0xa8] sm:$0xff] %v4469_v39  ;;  %4492 = vpow2.f32 %v3759_v59  ;;  %v5915_v47 = vadd.f32 %v3802_v43, %v3801_v40  ;;  %v3804_v53 = vpop.f32.mrb[62].mxu1  ;;  %v1264_v40 = vsub.s32 6, %v4995_v56 }
 0x3e2   :  { %v4473_v41 = vpop.eup %4472  ;;  %v3184_v42 = vadd.f32 1.0, %v4471_v0  ;;  %4494 = vpow2.f32 %v3761_v37  ;;  %v3805_v63 = vpop.f32.mrb[63].mxu1 }
 0x3e3   :  { %v4475_v45 = vpop.eup %4474  ;;  %v3183_v46 = vadd.f32 1.0, %v4473_v41  ;;  %v5917_v12 = vadd.f32 %v3805_v63, %v3804_v53 }
 0x3e4   :  { %v4477_v55 = vpop.eup %4476  ;;  %4496 = vrcp.f32 %v3184_v42  ;;  %v3185_v58 = vadd.f32 1.0, %v4475_v45 }
 0x3e5   :  { %v4479_v7 = vpop.eup %4478  ;;  %4498 = vrcp.f32 %v3183_v46  ;;  %v3189_v28 = vadd.f32 1.0, %v4477_v55  ;;  %v5941_v55 = vrot.slane %v5844_v2, %v1264_v40 }
 0x3e6   :  { %v4481_v8 = vpop.eup %4480  ;;  %4500 = vrcp.f32 %v3185_v58  ;;  %v3191_v10 = vadd.f32 1.0, %v4479_v7 }
 0x3e7   :  { %v4483_v50 = vpop.eup %4482  ;;  %4502 = vrcp.f32 %v3189_v28  ;;  %v3190_v60 = vadd.f32 1.0, %v4481_v8  ;;  %v3807_v16 = vpop.f32.mrb[64].mxu1 }
 0x3e8   :  { %v4485_v61 = vpop.eup %4484  ;;  %4504 = vrcp.f32 %v3191_v10  ;;  %v3192_v48 = vadd.f32 1.0, %v4483_v50  ;;  %v3808_v30 = vpop.f32.mrb[65].mxu1 }
 0x3e9   :  { %v4487_v14 = vpop.eup %4486  ;;  %4506 = vrcp.f32 %v3190_v60  ;;  %v3196_v15 = vadd.f32 1.0, %v4485_v61  ;;  %v5925_v21 = vadd.f32 %v3808_v30, %v3807_v16  ;;  %v3810_v44 = vpop.f32.mrb[66].mxu1  ;;  %v2898_v60 = vadd.f32 %v5911_v54, %v5941_v55 }
 0x3ea   :  { %v4489_v23 = vpop.eup %4488  ;;  %4508 = vrcp.f32 %v3192_v48  ;;  %v3198_v34 = vadd.f32 1.0, %v4487_v14  ;;  %v3811_v26 = vpop.f32.mrb[67].mxu1 }
 0x3eb   :  { %v4491_v18 = vpop.eup %4490  ;;  %4510 = vrcp.f32 %v3196_v15  ;;  %v3197_v19 = vadd.f32 1.0, %v4489_v23  ;;  %v5931_v57 = vadd.f32 %v3811_v26, %v3810_v44  ;;  %v2901_v15 = vadd.f32 %v5913_v32, %v5941_v55 }
 0x3ec   :  { %v4493_v22 = vpop.eup %4492  ;;  %4512 = vrcp.f32 %v3198_v34  ;;  %v3199_v24 = vadd.f32 1.0, %v4491_v18  ;;  %v2906_v26 = vadd.f32 %v5915_v47, %v5941_v55 }
 0x3ed   :  { %v4495_v27 = vpop.eup %4494  ;;  %4514 = vrcp.f32 %v3197_v19  ;;  %v3203_v51 = vadd.f32 1.0, %v4493_v22  ;;  %v2917_v40 = vadd.f32 %v5931_v57, %v5941_v55 }
 0x3ee   :  { %v4497_v29 = vpop.eup %4496  ;;  %4516 = vrcp.f32 %v3199_v24  ;;  %v3205_v52 = vadd.f32 1.0, %v4495_v27 }
 0x3ef   :  { %v4499_v31 = vpop.eup %4498  ;;  %3353 = vst [vmem:[#allocation2 + $0xb8] sm:$0xff] %v4497_v29  ;;  %4518 = vrcp.f32 %v3203_v51  ;;  %v3813_v6 = vpop.f32.mrb[68].mxu1  ;;  %v2909_v29 = vadd.f32 %v5917_v12, %v5941_v55  ;;  %v2914_v12 = vadd.f32 %v5925_v21, %v5941_v55 }
 0x3f0   :  { %v4501_v5 = vpop.eup %4500  ;;  %3352 = vst [vmem:[#allocation2 + $0xb0] sm:$0xff] %v4499_v31  ;;  %4520 = vrcp.f32 %v3205_v52  ;;  %v3814_v37 = vpop.f32.mrb[69].mxu1 }
 0x3f1   :  { %v4503_v33 = vpop.eup %4502  ;;  %3354 = vst [vmem:[#allocation2 + $0xc0] sm:$0xff] %v4501_v5  ;;  %4522 = vpow2.f32 %v3760_v1  ;;  %v5935_v49 = vadd.f32 %v3814_v37, %v3813_v6  ;;  %v3816_v9 = vpop.f32.mrb[70].mxu1 }
 0x3f2   :  { %v4505_v59 = vpop.eup %4504  ;;  %3358 = vst [vmem:[#allocation2 + $0xe0] sm:$0xff] %v4503_v33  ;;  %4524 = vpow2.f32 %v3762_v38  ;;  %v3817_v41 = vpop.f32.mrb[71].mxu1 }
 0x3f3   :  { %v4507_v39 = vpop.eup %4506  ;;  %3360 = vst [vmem:[#allocation2 + $0xf0] sm:$0xff] %v4505_v59  ;;  %4526 = vpow2.f32 %v3766_v11  ;;  %v5938_v43 = vadd.f32 %v3817_v41, %v3816_v9 }
 0x3f4   :  { %v4509_v0 = vpop.eup %4508  ;;  %3359 = vst [vmem:[#allocation2 + $0xe8] sm:$0xff] %v4507_v39  ;;  %4528 = vpow2.f32 %v3768_v62 }
 0x3f5   :  { %v4511_v42 = vpop.eup %4510  ;;  %3361 = vst [vmem:[#allocation2 + $0xf8] sm:$0xff] %v4509_v0  ;;  %4530 = vpow2.f32 %v3767_v13 }
 0x3f6   :  { %v4513_v45 = vpop.eup %4512  ;;  %3365 = vst [vmem:[#allocation2 + $0x118] sm:$0xff] %v4511_v42  ;;  %4532 = vpow2.f32 %v3769_v4 }
 0x3f7   :  { %v4515_v46 = vpop.eup %4514  ;;  %3367 = vst [vmem:[#allocation2 + $0x128] sm:$0xff] %v4513_v45 }
 0x3f8   :  { %v4517_v53 = vpop.eup %4516  ;;  %3366 = vst [vmem:[#allocation2 + $0x120] sm:$0xff] %v4515_v46  ;;  %v3835_v7 = vpop.f32.mrb[72].mxu1 }
 0x3f9   :  { %v4519_v58 = vpop.eup %4518  ;;  %3368 = vst [vmem:[#allocation2 + $0x130] sm:$0xff] %v4517_v53  ;;  %v3836_v8 = vpop.f32.mrb[73].mxu1 }
 0x3fa   :  { %v4521_v63 = vpop.eup %4520  ;;  %3372 = vst [vmem:[#allocation2 + $0x150] sm:$0xff] %v4519_v58  ;;  %v3837_v61 = vadd.f32 %v3836_v8, %v3835_v7  ;;  %v3838_v48 = vpop.f32.mrb[74].mxu1 }
 0x3fb   :  { %v4523_v28 = vpop.eup %4522  ;;  %3374 = vst [vmem:[#allocation2 + $0x160] sm:$0xff] %v4521_v63  ;;  %v3839_v16 = vpop.f32.mrb[75].mxu1 }
 0x3fc   :  { %v4525_v10 = vpop.eup %4524  ;;  %v3204_v50 = vadd.f32 1.0, %v4523_v28  ;;  %v2963_v17 = vadd.f32 %v3837_v61, %v2898_v60  ;;  %v3840_v30 = vadd.f32 %v3839_v16, %v3838_v48 }
 0x3fd   :  { %v4527_v36 = vpop.eup %4526  ;;  %v3206_v14 = vadd.f32 1.0, %v4525_v10  ;;  %v2922_v10 = vadd.f32 %v5935_v49, %v5941_v55 }
 0x3fe   :  { %v4529_v23 = vpop.eup %4528  ;;  %4534 = vrcp.f32 %v3204_v50  ;;  %v3210_v34 = vadd.f32 1.0, %v4527_v36  ;;  %v3723_v54 = vmul.f32 -1.442695, %v2963_v17  ;;  %v2966_v22 = vadd.f32 %v3840_v30, %v2901_v15 }
 0x3ff   :  { %v4531_v18 = vpop.eup %4530  ;;  %4536 = vrcp.f32 %v3206_v14  ;;  %v3212_v19 = vadd.f32 1.0, %v4529_v23  ;;  %v2925_v36 = vadd.f32 %v5938_v43, %v5941_v55 }
 0x400   :  { %v4533_v20 = vpop.eup %4532  ;;  %4538 = vrcp.f32 %v3210_v34  ;;  %v3211_v44 = vadd.f32 1.0, %v4531_v18  ;;  %v3730_v1 = vmul.f32 -1.442695, %v2966_v22  ;;  %v3841_v25 = vpop.f32.mrb[76].mxu1 }
 0x401   :  { %4540 = vrcp.f32 %v3212_v19  ;;  %v3213_v24 = vadd.f32 1.0, %v4533_v20  ;;  %v3842_v32 = vpop.f32.mrb[77].mxu1 }
 0x402   :  { %4542 = vrcp.f32 %v3211_v44  ;;  %v3843_v27 = vadd.f32 %v3842_v32, %v3841_v25  ;;  %v3844_v51 = vpop.f32.mrb[78].mxu1 }
 0x403   :  { %4544 = vrcp.f32 %v3213_v24  ;;  %v3845_v35 = vpop.f32.mrb[79].mxu1 }
 0x404   :  { %4546 = vpow2.f32 %v3723_v54  ;;  %v2971_v52 = vadd.f32 %v3843_v27, %v2906_v26  ;;  %v3846_v38 = vadd.f32 %v3845_v35, %v3844_v51  ;;  %v1256_v51 = vsub.s32 4, %v4995_v56 }
 0x405   :  { %4548 = vpow2.f32 %v3730_v1  ;;  %v1260_v35 = vsub.s32 5, %v4995_v56 }
 0x406   :  { %v3737_v31 = vmul.f32 -1.442695, %v2971_v52  ;;  %v2974_v11 = vadd.f32 %v3846_v38, %v2909_v29  ;;  %v5970_v29 = vrot.slane %v5844_v2, %v1256_v51 }
 0x407   :  { %v5973_v52 = vrot.slane %v5844_v2, %v1260_v35 }
 0x408   :  { %v4535_v3 = vpop.eup %4534  ;;  %4550 = vpow2.f32 %v3737_v31  ;;  %v3744_v33 = vmul.f32 -1.442695, %v2974_v11  ;;  %v3847_v47 = vpop.f32.mrb[80].mxu1 }
 0x409   :  { %v4537_v5 = vpop.eup %4536  ;;  %3373 = vst [vmem:[#allocation2 + $0x158] sm:$0xff] %v4535_v3  ;;  %v3848_v6 = vpop.f32.mrb[81].mxu1 }
 0x40a   :  { %v4539_v62 = vpop.eup %4538  ;;  %3375 = vst [vmem:[#allocation2 + $0x168] sm:$0xff] %v4537_v5  ;;  %4552 = vpow2.f32 %v3744_v33  ;;  %v3849_v4 = vadd.f32 %v3848_v6, %v3847_v47  ;;  %v3850_v37 = vpop.f32.mrb[82].mxu1 }
 0x40b   :  { %v4541_v13 = vpop.eup %4540  ;;  %3379 = vst [vmem:[#allocation2 + $0x188] sm:$0xff] %v4539_v62  ;;  %v3851_v9 = vpop.f32.mrb[83].mxu1 }
 0x40c   :  { %v4543_v59 = vpop.eup %4542  ;;  %3381 = vst [vmem:[#allocation2 + $0x198] sm:$0xff] %v4541_v13  ;;  %v2979_v41 = vadd.f32 %v3849_v4, %v2914_v12  ;;  %v3852_v42 = vadd.f32 %v3851_v9, %v3850_v37 }
 0x40d   :  { %v4545_v39 = vpop.eup %4544  ;;  %3380 = vst [vmem:[#allocation2 + $0x190] sm:$0xff] %v4543_v59 }
 0x40e   :  { %v4547_v0 = vpop.eup %4546  ;;  %3382 = vst [vmem:[#allocation2 + $0x1a0] sm:$0xff] %v4545_v39  ;;  %v3751_v58 = vmul.f32 -1.442695, %v2979_v41  ;;  %v2982_v63 = vadd.f32 %v3852_v42, %v2917_v40 }
 0x40f   :  { %v4549_v45 = vpop.eup %4548  ;;  %v3167_v46 = vadd.f32 1.0, %v4547_v0 }
 0x410   :  { %v3174_v53 = vadd.f32 1.0, %v4549_v45  ;;  %v3758_v21 = vmul.f32 -1.442695, %v2982_v63  ;;  %v3853_v7 = vpop.f32.mrb[84].mxu1 }
 0x411   :  { %4554 = vrcp.f32 %v3167_v46  ;;  %v3854_v28 = vpop.f32.mrb[85].mxu1 }
 0x412   :  { %4556 = vrcp.f32 %v3174_v53  ;;  %v4551_v8 = vpop.eup %4550  ;;  %v3855_v50 = vadd.f32 %v3854_v28, %v3853_v7  ;;  %v3856_v57 = vpop.f32.mrb[86].mxu1 }
 0x413   :  { %4558 = vpow2.f32 %v3751_v58  ;;  %v3181_v60 = vadd.f32 1.0, %v4551_v8  ;;  %v3857_v61 = vpop.f32.mrb[87].mxu1 }
 0x414   :  { %4560 = vpow2.f32 %v3758_v21  ;;  %v4553_v48 = vpop.eup %4552  ;;  %v2987_v14 = vadd.f32 %v3855_v50, %v2922_v10  ;;  %v3858_v15 = vadd.f32 %v3857_v61, %v3856_v57 }
 0x415   :  { %4562 = vrcp.f32 %v3181_v60  ;;  %v3188_v16 = vadd.f32 1.0, %v4553_v48 }
 0x416   :  { %v3765_v23 = vmul.f32 -1.442695, %v2987_v14  ;;  %v2990_v34 = vadd.f32 %v3858_v15, %v2925_v36 }
 0x417   :  { %4564 = vrcp.f32 %v3188_v16 }
 0x418   :  { %4566 = vpow2.f32 %v3765_v23  ;;  %v3772_v17 = vmul.f32 -1.442695, %v2990_v34 }
 0x41a   :  { %4568 = vpow2.f32 %v3772_v17 }
 0x41b   :  { %v4555_v49 = vpop.eup %4554 }
 0x41c   :  { %v4557_v30 = vpop.eup %4556  ;;  %3336 = vst.msk [vmem:[#allocation2 + $0x30] sm:$0xff] %vm3335_vm2, %v4555_v49 }
 0x41d   :  { %v4559_v18 = vpop.eup %4558  ;;  %3343 = vst.msk [vmem:[#allocation2 + $0x68] sm:$0xff] %vm3335_vm2, %v4557_v30 }
 0x41e   :  { %v4561_v19 = vpop.eup %4560  ;;  %v3195_v43 = vadd.f32 1.0, %v4559_v18 }
 0x41f   :  { %v3202_v55 = vadd.f32 1.0, %v4561_v19  ;;  %v4563_v20 = vpop.eup %4562 }
 0x420   :  { %4570 = vrcp.f32 %v3195_v43  ;;  %3350 = vst.msk [vmem:[#allocation2 + $0xa0] sm:$0xff] %vm3335_vm2, %v4563_v20 }
 0x421   :  { %4572 = vrcp.f32 %v3202_v55  ;;  %v4565_v44 = vpop.eup %4564 }
 0x422   :  { %v4567_v54 = vpop.eup %4566  ;;  %3357 = vst.msk [vmem:[#allocation2 + $0xd8] sm:$0xff] %vm3335_vm2, %v4565_v44 }
 0x423   :  { %v3209_v22 = vadd.f32 1.0, %v4567_v54 }
 0x424   :  { %v4569_v24 = vpop.eup %4568 }
 0x425   :  { %4574 = vrcp.f32 %v3209_v22  ;;  %v3216_v1 = vadd.f32 1.0, %v4569_v24 }
 0x427   :  { %4576 = vrcp.f32 %v3216_v1 }
 0x42a   :  { %v4571_v25 = vpop.eup %4570 }
 0x42b   :  { %v4573_v32 = vpop.eup %4572  ;;  %3364 = vst.msk [vmem:[#allocation2 + $0x110] sm:$0xff] %vm3335_vm2, %v4571_v25 }
 0x42c   :  { %3371 = vst.msk [vmem:[#allocation2 + $0x148] sm:$0xff] %vm3335_vm2, %v4573_v32 }
 0x42f   :  { %v4575_v26 = vpop.eup %4574 }
 0x430   :  { %3378 = vst.msk [vmem:[#allocation2 + $0x180] sm:$0xff] %vm3335_vm2, %v4575_v26 }
 0x431   :  { %v4577_v27 = vpop.eup %4576 }
 0x432   :  { %3385 = vst.msk [vmem:[#allocation2 + $0x1b8] sm:$0xff] %vm3335_vm2, %v4577_v27 }
 0x438   :  { %v2824_v38 = vpop.f32.mrb[32].mxu0 }
 0x439   :  { %v3903_v3 = vadd.f32 %v2824_v38, %v5970_v29  ;;  %v2826_v31 = vpop.f32.mrb[33].mxu0 }
 0x43a   :  { %v3904_v11 = vadd.f32 %v2826_v31, %v5973_v52  ;;  %v2828_v5 = vpop.f32.mrb[34].mxu0 }
 0x43b   :  { %v3721_v62 = vmul.f32 -1.442695, %v3903_v3  ;;  %v3905_v33 = vadd.f32 %v2828_v5, %v5970_v29  ;;  %v2830_v47 = vpop.f32.mrb[35].mxu0 }
 0x43c   :  { %v3722_v13 = vmul.f32 -1.442695, %v3904_v11  ;;  %v3906_v56 = vadd.f32 %v2830_v47, %v5973_v52 }
 0x43d   :  { %4578 = vpow2.f32 %v3721_v62  ;;  %v3728_v6 = vmul.f32 -1.442695, %v3905_v33 }
 0x43e   :  { %4580 = vpow2.f32 %v3722_v13  ;;  %v3729_v59 = vmul.f32 -1.442695, %v3906_v56 }
 0x43f   :  { %4582 = vpow2.f32 %v3728_v6 }
 0x440   :  { %4584 = vpow2.f32 %v3729_v59  ;;  %v2834_v2 = vpop.f32.mrb[36].mxu0 }
 0x441   :  { %v3907_v12 = vadd.f32 %v2834_v2, %v5970_v29  ;;  %v2836_v4 = vpop.f32.mrb[37].mxu0 }
 0x442   :  { %v3908_v37 = vadd.f32 %v2836_v4, %v5973_v52  ;;  %v2838_v39 = vpop.f32.mrb[38].mxu0 }
 0x443   :  { %v3735_v9 = vmul.f32 -1.442695, %v3907_v12  ;;  %v3909_v0 = vadd.f32 %v2838_v39, %v5970_v29  ;;  %v2840_v40 = vpop.f32.mrb[39].mxu0 }
 0x444   :  { %v3736_v41 = vmul.f32 -1.442695, %v3908_v37  ;;  %v3910_v42 = vadd.f32 %v2840_v40, %v5973_v52 }
 0x445   :  { %4586 = vpow2.f32 %v3735_v9  ;;  %v3742_v45 = vmul.f32 -1.442695, %v3909_v0 }
 0x446   :  { %4588 = vpow2.f32 %v3736_v41  ;;  %v3743_v46 = vmul.f32 -1.442695, %v3910_v42 }
 0x447   :  { %v4579_v53 = vpop.eup %4578  ;;  %4590 = vpow2.f32 %v3742_v45 }
 0x448   :  { %v4581_v58 = vpop.eup %4580  ;;  %v3165_v63 = vadd.f32 1.0, %v4579_v53  ;;  %4592 = vpow2.f32 %v3743_v46  ;;  %v2844_v21 = vpop.f32.mrb[40].mxu0 }
 0x449   :  { %v4583_v7 = vpop.eup %4582  ;;  %v3166_v28 = vadd.f32 1.0, %v4581_v58  ;;  %v3911_v8 = vadd.f32 %v2844_v21, %v5970_v29  ;;  %v2846_v10 = vpop.f32.mrb[41].mxu0 }
 0x44a   :  { %v4585_v50 = vpop.eup %4584  ;;  %4594 = vrcp.f32 %v3165_v63  ;;  %v3172_v57 = vadd.f32 1.0, %v4583_v7  ;;  %v3912_v60 = vadd.f32 %v2846_v10, %v5973_v52  ;;  %v2848_v61 = vpop.f32.mrb[42].mxu0 }
 0x44b   :  { %4596 = vrcp.f32 %v3166_v28  ;;  %v3173_v48 = vadd.f32 1.0, %v4585_v50  ;;  %v3749_v36 = vmul.f32 -1.442695, %v3911_v8  ;;  %v3913_v14 = vadd.f32 %v2848_v61, %v5970_v29  ;;  %v2850_v15 = vpop.f32.mrb[43].mxu0 }
 0x44c   :  { %4598 = vrcp.f32 %v3172_v57  ;;  %v3750_v16 = vmul.f32 -1.442695, %v3912_v60  ;;  %v3914_v23 = vadd.f32 %v2850_v15, %v5973_v52 }
 0x44d   :  { %4600 = vrcp.f32 %v3173_v48  ;;  %v3756_v34 = vmul.f32 -1.442695, %v3913_v14 }
 0x44e   :  { %4602 = vpow2.f32 %v3749_v36  ;;  %v3757_v17 = vmul.f32 -1.442695, %v3914_v23 }
 0x44f   :  { %v4587_v49 = vpop.eup %4586  ;;  %4604 = vpow2.f32 %v3750_v16 }
 0x450   :  { %v4589_v30 = vpop.eup %4588  ;;  %v3179_v18 = vadd.f32 1.0, %v4587_v49  ;;  %4606 = vpow2.f32 %v3756_v34  ;;  %v2854_v19 = vpop.f32.mrb[44].mxu0 }
 0x451   :  { %v4591_v43 = vpop.eup %4590  ;;  %v3180_v55 = vadd.f32 1.0, %v4589_v30  ;;  %4608 = vpow2.f32 %v3757_v17  ;;  %v3915_v20 = vadd.f32 %v2854_v19, %v5970_v29  ;;  %v2856_v44 = vpop.f32.mrb[45].mxu0 }
 0x452   :  { %v4593_v54 = vpop.eup %4592  ;;  %4610 = vrcp.f32 %v3179_v18  ;;  %v3186_v22 = vadd.f32 1.0, %v4591_v43  ;;  %v3916_v24 = vadd.f32 %v2856_v44, %v5973_v52  ;;  %v2858_v1 = vpop.f32.mrb[46].mxu0 }
 0x453   :  { %4612 = vrcp.f32 %v3180_v55  ;;  %v3187_v25 = vadd.f32 1.0, %v4593_v54  ;;  %v3763_v32 = vmul.f32 -1.442695, %v3915_v20  ;;  %v3917_v26 = vadd.f32 %v2858_v1, %v5970_v29  ;;  %v2860_v27 = vpop.f32.mrb[47].mxu0 }
 0x454   :  { %v4595_v51 = vpop.eup %4594  ;;  %4614 = vrcp.f32 %v3186_v22  ;;  %v3764_v35 = vmul.f32 -1.442695, %v3916_v24  ;;  %v3918_v38 = vadd.f32 %v2860_v27, %v5973_v52 }
 0x455   :  { %v4597_v3 = vpop.eup %4596  ;;  %3333 = vst [vmem:[#allocation2 + $0x20] sm:$0xff] %v4595_v51  ;;  %4616 = vrcp.f32 %v3187_v25  ;;  %v3770_v31 = vmul.f32 -1.442695, %v3917_v26 }
 0x456   :  { %v4599_v11 = vpop.eup %4598  ;;  %3334 = vst [vmem:[#allocation2 + $0x28] sm:$0xff] %v4597_v3  ;;  %4618 = vpow2.f32 %v3763_v32  ;;  %v3771_v5 = vmul.f32 -1.442695, %v3918_v38 }
 0x457   :  { %v4601_v62 = vpop.eup %4600  ;;  %3341 = vst [vmem:[#allocation2 + $0x58] sm:$0xff] %v4599_v11  ;;  %4620 = vpow2.f32 %v3764_v35 }
 0x458   :  { %v4603_v33 = vpop.eup %4602  ;;  %3342 = vst [vmem:[#allocation2 + $0x60] sm:$0xff] %v4601_v62  ;;  %4622 = vpow2.f32 %v3770_v31 }
 0x459   :  { %v4605_v29 = vpop.eup %4604  ;;  %v3193_v47 = vadd.f32 1.0, %v4603_v33  ;;  %4624 = vpow2.f32 %v3771_v5 }
 0x45a   :  { %v4607_v13 = vpop.eup %4606  ;;  %v3194_v56 = vadd.f32 1.0, %v4605_v29 }
 0x45b   :  { %v4609_v52 = vpop.eup %4608  ;;  %4626 = vrcp.f32 %v3193_v47  ;;  %v3200_v6 = vadd.f32 1.0, %v4607_v13 }
 0x45c   :  { %v4611_v59 = vpop.eup %4610  ;;  %4628 = vrcp.f32 %v3194_v56  ;;  %v3201_v2 = vadd.f32 1.0, %v4609_v52 }
 0x45d   :  { %v4613_v12 = vpop.eup %4612  ;;  %3348 = vst [vmem:[#allocation2 + $0x90] sm:$0xff] %v4611_v59  ;;  %4630 = vrcp.f32 %v3200_v6 }
 0x45e   :  { %v4615_v4 = vpop.eup %4614  ;;  %3349 = vst [vmem:[#allocation2 + $0x98] sm:$0xff] %v4613_v12  ;;  %4632 = vrcp.f32 %v3201_v2 }
 0x45f   :  { %v4617_v37 = vpop.eup %4616  ;;  %3355 = vst [vmem:[#allocation2 + $0xc8] sm:$0xff] %v4615_v4 }
 0x460   :  { %v4619_v39 = vpop.eup %4618  ;;  %3356 = vst [vmem:[#allocation2 + $0xd0] sm:$0xff] %v4617_v37 }
 0x461   :  { %v4621_v9 = vpop.eup %4620  ;;  %v3207_v0 = vadd.f32 1.0, %v4619_v39 }
 0x462   :  { %v4623_v40 = vpop.eup %4622  ;;  %v3208_v41 = vadd.f32 1.0, %v4621_v9 }
 0x463   :  { %v4625_v42 = vpop.eup %4624  ;;  %4634 = vrcp.f32 %v3207_v0  ;;  %v3214_v45 = vadd.f32 1.0, %v4623_v40 }
 0x464   :  { %4636 = vrcp.f32 %v3208_v41  ;;  %v3215_v46 = vadd.f32 1.0, %v4625_v42 }
 0x465   :  { %v4627_v53 = vpop.eup %4626  ;;  %4638 = vrcp.f32 %v3214_v45 }
 0x466   :  { %v4629_v58 = vpop.eup %4628  ;;  %3362 = vst [vmem:[#allocation2 + $0x100] sm:$0xff] %v4627_v53  ;;  %4640 = vrcp.f32 %v3215_v46 }
 0x467   :  { %v4631_v63 = vpop.eup %4630  ;;  %3363 = vst [vmem:[#allocation2 + $0x108] sm:$0xff] %v4629_v58 }
 0x468   :  { %v4633_v21 = vpop.eup %4632  ;;  %3369 = vst [vmem:[#allocation2 + $0x138] sm:$0xff] %v4631_v63 }
 0x469   :  { %3370 = vst [vmem:[#allocation2 + $0x140] sm:$0xff] %v4633_v21 }
 0x46d   :  { %v4635_v7 = vpop.eup %4634 }
 0x46e   :  { %v4637_v28 = vpop.eup %4636  ;;  %3376 = vst [vmem:[#allocation2 + $0x170] sm:$0xff] %v4635_v7 }
 0x46f   :  { %v4639_v8 = vpop.eup %4638  ;;  %3377 = vst [vmem:[#allocation2 + $0x178] sm:$0xff] %v4637_v28 }
 0x470   :  { %v4641_v10 = vpop.eup %4640  ;;  %3383 = vst [vmem:[#allocation2 + $0x1a8] sm:$0xff] %v4639_v8 }
 0x471   :  { %3384 = vst [vmem:[#allocation2 + $0x1b0] sm:$0xff] %v4641_v10 }
 0x472   :  { %4653 = shalt.err (!%p4650_p4)
}
 0x473   :  { %s4654_s22 = scalar_lea.hbm %s6012_s9, 7168 }
 0x474   :  { %p4655_p5 = scmp.ne.s32.totalorder %s6012_s9, %s4654_s22  ;;  %p4658_p6 = scmp.lt.u32.totalorder %s4654_s22, %s6012_s9 }
 0x476   :  { %p4660_p7 = pnand %p4658_p6, %p4655_p5 }
 0x478   :  { %4663 = shalt.err (!%p4660_p7)
}
 0x479   :  { %s4668_s27 = smov 896   ;;  %s4669_s28 = smov 56  }
 0x47a   :  { %3397 = dma.vmem_to_hbm [thread:$0]  %s3392_s8, 7168, %s6012_s9, [#allocation3], %s4668_s27, %s4668_s27, %s4669_s28  }
 0x47b   :  { %4664 = dma.done.wait [#allocation3], 7168  }
 0x47c   :  { %4665 = vsyncadd [#allocation3], 4294960128 }
 0x47d   :  { %3401 = vsyncpa [#allocation3], 1 }

</bundles_post_ra>
